<compile_context>
chip_gen: v5e
topology: v5e:2x2
jax: 0.10.0
libtpu: 0.0.40
codegen_flags: <defaults>
</compile_context>

<pallas_src>
import functools

import jax
import jax.numpy as jnp
from jax.experimental import pallas as pl
from jax.experimental.pallas import tpu as pltpu


def fire_kernel(x_ref, wsq_ref, bsq_ref, w1_ref, b1_ref, w3f_ref, b3_ref,
                out_ref, *, th):
    BB, H, W, Cin = x_ref.shape
    Csq = wsq_ref.shape[1]
    Ce1 = w1_ref.shape[1]
    Ce3 = w3f_ref.shape[1]
    Cout = out_ref.shape[3]
    M = BB * H * W

    # ---- squeeze: 1x1 conv == channel matmul; bf16 cast happens here ----
    x2d = x_ref[...].reshape(M, Cin).astype(jnp.bfloat16)
    s = jnp.dot(x2d, wsq_ref[...], preferred_element_type=jnp.float32)
    s = jnp.maximum(s + bsq_ref[...], 0.0)                     # (M, Csq) f32
    s_bf = s.astype(jnp.bfloat16).reshape(BB, H, W, Csq)

    # ---- one zero-padded copy of s; every 3x3 tap is a static window of it --
    zcol = jnp.zeros((BB, H, 1, Csq), jnp.bfloat16)
    sp = jnp.concatenate([zcol, s_bf, zcol], axis=2)           # (BB, H,   W+2, Csq)
    zrow = jnp.zeros((BB, 1, W + 2, Csq), jnp.bfloat16)
    sp = jnp.concatenate([zrow, sp, zrow], axis=1)             # (BB, H+2, W+2, Csq)

    aligned = (Ce1 % 128 == 0) and (Ce3 % 128 == 0)

    # ---- expand stage, tiled over H in chunks of `th` rows ----
    for h0 in range(0, H, th):
        MC = BB * th * W

        # 1x1 branch: centre window of sp == s rows [h0, h0+th)
        ctr = sp[:, 1 + h0:1 + h0 + th, 1:1 + W, :].reshape(MC, Csq)
        e1 = jnp.dot(ctr, w1_ref[...], preferred_element_type=jnp.float32)
        e1 = jnp.maximum(e1 + b1_ref[...], 0.0)                # (MC, Ce1) f32

        # 3x3 branch: K-stack the 9 taps -> single matmul with K = 9*Csq
        taps = [
            sp[:, dy + h0:dy + h0 + th, dx:dx + W, :].reshape(MC, Csq)
            for dy in range(3) for dx in range(3)
        ]
        cols = jnp.concatenate(taps, axis=-1)                  # (MC, 9*Csq) bf16
        e3 = jnp.dot(cols, w3f_ref[...], preferred_element_type=jnp.float32)
        e3 = jnp.maximum(e3 + b3_ref[...], 0.0)                # (MC, Ce3) f32

        if aligned:
            # Lane-dense, unmasked sub-stores; no in-register concat copy.
            out_ref[:, h0:h0 + th, :, :Ce1] = (
                e1.reshape(BB, th, W, Ce1).astype(out_ref.dtype))
            out_ref[:, h0:h0 + th, :, Ce1:] = (
                e3.reshape(BB, th, W, Ce3).astype(out_ref.dtype))
        else:
            # NOTE: for Cout < 128 the store is masked; packing W*Cout into the
            # lane dim would make it unmasked, left out to keep a single layout.
            out = jnp.concatenate([e1, e3], axis=-1)           # (MC, Cout)
            out_ref[:, h0:h0 + th, :, :] = (
                out.reshape(BB, th, W, Cout).astype(out_ref.dtype))


# ----------------------------- size heuristics ------------------------------

_BLOCK_VMEM_BUDGET = 16 << 20     # budget used to choose BB (images per step)
_CHUNK_VMEM_BUDGET = 4 << 20      # budget used to choose the H chunk size


def _chunk_bytes(bb, th, W, Csq, Ce1, Ce3, out_bytes):
    mc = bb * th * W
    cout = Ce1 + Ce3
    # cols (bf16) + centre view (bf16) + e1/e3 (f32) + staged output
    return mc * (9 * Csq * 2 + Csq * 2 + 4 * (Ce1 + Ce3) + (4 + out_bytes) * cout)


def _block_bytes(bb, th, H, W, Cin, Csq, Ce1, Ce3, in_bytes, out_bytes):
    m = bb * H * W
    cout = Ce1 + Ce3
    io = 2 * m * Cin * in_bytes + 2 * m * cout * out_bytes      # double-buffered DMA
    wgt = 2 * 2 * (Cin * Csq + Csq * Ce1 + 9 * Csq * Ce3)       # bf16 weights, 2 bufs
    resident = m * Cin * 2 + 6 * m * Csq \
        + 2 * bb * (H + 2) * (W + 2) * Csq                      # x_bf, s, s_bf, padded s
    return io + wgt + resident + _chunk_bytes(bb, th, W, Csq, Ce1, Ce3, out_bytes)


def _pick_th(H, bb, W, Csq, Ce1, Ce3, out_bytes):
    for th in range(H, 0, -1):
        if H % th == 0 and _chunk_bytes(bb, th, W, Csq, Ce1, Ce3,
                                        out_bytes) <= _CHUNK_VMEM_BUDGET:
            return th
    return 1


def _pick_block(B, H, W, Cin, Csq, Ce1, Ce3, in_bytes, out_bytes):
    # Cap BB so grid = B // BB >= 2 when possible (pipeline overlap + 2 TCs).
    max_bb = max(1, B // 2)
    best = (1, _pick_th(H, 1, W, Csq, Ce1, Ce3, out_bytes))
    for bb in range(2, max_bb + 1):
        if B % bb:
            continue
        th = _pick_th(H, bb, W, Csq, Ce1, Ce3, out_bytes)
        if _block_bytes(bb, th, H, W, Cin, Csq, Ce1, Ce3, in_bytes,
                        out_bytes) <= _BLOCK_VMEM_BUDGET:
            best = (bb, th)
    return best


# --------------------------------- wrappers ---------------------------------

def fire_forward_nhwc(x_nhwc, params, *, out_dtype=None, lane_multiple=1):
    """Core entry point: x (B, H, W, Cin) -> (B, H, W, Ce1+Ce3), NHWC in/out."""
    wsq, bsq, w1, b1, w3, b3 = params
    B, H, W, Cin = x_nhwc.shape
    Csq = wsq.shape[1]
    Ce1 = w1.shape[1]
    Ce3 = w3.shape[3]
    Cout = Ce1 + Ce3
    out_dtype = x_nhwc.dtype if out_dtype is None else out_dtype

    # Optional MXU-tile padding of the contraction dims (Cin, Csq -> 9*Csq).
    # Output channels are untouched so the module contract is unchanged;
    # padding Ce1/Ce3 to 128 must be done one level up if the consumer allows.
    if lane_multiple > 1:
        cin_pad = (-Cin) % lane_multiple
        csq_pad = (-Csq) % lane_multiple
        if cin_pad:
            x_nhwc = jnp.pad(x_nhwc, ((0, 0), (0, 0), (0, 0), (0, cin_pad)))
            wsq = jnp.pad(wsq, ((0, cin_pad), (0, 0)))
        if csq_pad:
            wsq = jnp.pad(wsq, ((0, 0), (0, csq_pad)))
            bsq = jnp.pad(bsq, ((0, 0), (0, csq_pad)))
            w1 = jnp.pad(w1, ((0, csq_pad), (0, 0)))
            w3 = jnp.pad(w3, ((0, 0), (0, 0), (0, csq_pad), (0, 0)))
        Cin += cin_pad
        Csq += csq_pad

    # bf16 MXU weights (biases stay f32; accumulation is f32).  The activation
    # x is NOT cast here -- that happens in-kernel (no extra HBM pass).
    wsq_b = wsq.astype(jnp.bfloat16)
    w1_b = w1.astype(jnp.bfloat16)
    w3f_b = w3.reshape(9 * Csq, Ce3).astype(jnp.bfloat16)   # K-stacked 3x3 weight

    in_bytes = jnp.dtype(x_nhwc.dtype).itemsize
    out_bytes = jnp.dtype(out_dtype).itemsize
    BB, TH = _pick_block(B, H, W, Cin, Csq, Ce1, Ce3, in_bytes, out_bytes)
    need = _block_bytes(BB, TH, H, W, Cin, Csq, Ce1, Ce3, in_bytes, out_bytes)
    vmem_limit = int(min(max(2 * need, 16 << 20), 40 << 20))

    kernel = functools.partial(fire_kernel, th=TH)
    out = pl.pallas_call(
        kernel,
        out_shape=jax.ShapeDtypeStruct((B, H, W, Cout), out_dtype),
        grid=(B // BB,),
        in_specs=[
            pl.BlockSpec((BB, H, W, Cin), lambda b: (b, 0, 0, 0)),
            pl.BlockSpec((Cin, Csq), lambda b: (0, 0)),          # squeeze weight
            pl.BlockSpec((1, Csq), lambda b: (0, 0)),            # squeeze bias
            pl.BlockSpec((Csq, Ce1), lambda b: (0, 0)),          # expand1x1 weight
            pl.BlockSpec((1, Ce1), lambda b: (0, 0)),            # expand1x1 bias
            pl.BlockSpec((9 * Csq, Ce3), lambda b: (0, 0)),      # expand3x3 weight (K-stacked)
            pl.BlockSpec((1, Ce3), lambda b: (0, 0)),            # expand3x3 bias
        ],
        out_specs=pl.BlockSpec((BB, H, W, Cout), lambda b: (b, 0, 0, 0)),
        compiler_params=pltpu.CompilerParams(
            dimension_semantics=("parallel",),
            vmem_limit_bytes=vmem_limit),
    )(x_nhwc, wsq_b, bsq, w1_b, b1, w3f_b, b3)
    return out


def fire_forward(x_nchw, params):
    """PyTorch-parity wrapper: NCHW in / NCHW out.

    The transposes live outside the kernel; channels-last callers should use
    fire_forward_nhwc directly (optionally with bf16 activations) and skip them.
    """
    out = fire_forward_nhwc(jnp.transpose(x_nchw, (0, 2, 3, 1)), params)
    return jnp.transpose(out, (0, 3, 1, 2))


def fire_reference(x_nchw, params):
    """Plain-JAX f32 reference (matches the PyTorch module) for verification."""
    wsq, bsq, w1, b1, w3, b3 = params
    x = jnp.transpose(x_nchw, (0, 2, 3, 1)).astype(jnp.float32)
    s = jnp.maximum(jnp.einsum("bhwc,cd->bhwd", x, wsq) + bsq[0], 0.0)
    e1 = jnp.maximum(jnp.einsum("bhwc,cd->bhwd", s, w1) + b1[0], 0.0)
    sp = jnp.pad(s, ((0, 0), (1, 1), (1, 1), (0, 0)))
    H, W = x.shape[1], x.shape[2]
    e3 = jnp.zeros(x.shape[:3] + (w3.shape[3],), jnp.float32)
    for dy in range(3):
        for dx in range(3):
            e3 = e3 + jnp.einsum("bhwc,cd->bhwd",
                                 sp[:, dy:dy + H, dx:dx + W, :], w3[dy, dx])
    e3 = jnp.maximum(e3 + b3[0], 0.0)
    out = jnp.concatenate([e1, e3], axis=-1)
    return jnp.transpose(out, (0, 3, 1, 2))


def init_params(key, inplanes, squeeze_planes, e1_planes, e3_planes):
    ks = jax.random.split(key, 6)
    scale = 0.1
    wsq = scale * jax.random.normal(ks[0], (inplanes, squeeze_planes), jnp.float32)
    bsq = scale * jax.random.normal(ks[1], (1, squeeze_planes), jnp.float32)
    w1 = scale * jax.random.normal(ks[2], (squeeze_planes, e1_planes), jnp.float32)
    b1 = scale * jax.random.normal(ks[3], (1, e1_planes), jnp.float32)
    w3 = scale * jax.random.normal(ks[4], (3, 3, squeeze_planes, e3_planes), jnp.float32)
    b3 = scale * jax.random.normal(ks[5], (1, e3_planes), jnp.float32)
    return (wsq, bsq, w1, b1, w3, b3)


if __name__ == "__main__":
    # Small Fire config: inplanes=8, squeeze=4, expand1x1=8, expand3x3=8
    B, Cin, H, W = 2, 8, 16, 16
    Csq, Ce1, Ce3 = 4, 8, 8

    key = jax.random.PRNGKey(0)
    kx, kp = jax.random.split(key)
    x = jax.random.normal(kx, (B, Cin, H, W), jnp.float32)      # NCHW like PyTorch
    params = init_params(kp, Cin, Csq, Ce1, Ce3)

    out = jax.block_until_ready(fire_forward(x, params))
    ref = fire_reference(x, params)

    assert out.shape == (B, Ce1 + Ce3, H, W), out.shape
    # bf16 MXU operands with f32 accumulation -> ~1e-3 absolute error here.
    assert jnp.allclose(out, ref, atol=2e-2, rtol=2e-2), \
        float(jnp.max(jnp.abs(out - ref)))

    print("KERNEL_OK")
</pallas_src>

<mosaic_0001>
module attributes {stable_mosaic.version = 11 : i64} {
  func.func @fire_kernel(%arg0: i32, %arg1: memref<1x16x16x8xf32, #tpu.memory_space<vmem>>, %arg2: memref<8x4xbf16, #tpu.memory_space<vmem>>, %arg3: memref<1x4xf32, #tpu.memory_space<vmem>>, %arg4: memref<4x8xbf16, #tpu.memory_space<vmem>>, %arg5: memref<1x8xf32, #tpu.memory_space<vmem>>, %arg6: memref<36x8xbf16, #tpu.memory_space<vmem>>, %arg7: memref<1x8xf32, #tpu.memory_space<vmem>>, %arg8: memref<1x16x16x16xf32, #tpu.memory_space<vmem>>) attributes {dimension_semantics = [#tpu.dimension_semantics<parallel>], iteration_bounds = array<i64: 2>, scalar_prefetch = 0 : i64, scratch_operands = 0 : i64, tpu.core_type = #tpu.core_type<tc>, window_params = [{transform_indices = @transform_0, window_bounds = array<i64: 1, 16, 16, 8>}, {pipeline_mode = #tpu.pipeline_mode<synchronous>, transform_indices = @transform_1, window_bounds = array<i64: 8, 4>}, {pipeline_mode = #tpu.pipeline_mode<synchronous>, transform_indices = @transform_2, window_bounds = array<i64: 1, 4>}, {pipeline_mode = #tpu.pipeline_mode<synchronous>, transform_indices = @transform_3, window_bounds = array<i64: 4, 8>}, {pipeline_mode = #tpu.pipeline_mode<synchronous>, transform_indices = @transform_4, window_bounds = array<i64: 1, 8>}, {pipeline_mode = #tpu.pipeline_mode<synchronous>, transform_indices = @transform_5, window_bounds = array<i64: 36, 8>}, {pipeline_mode = #tpu.pipeline_mode<synchronous>, transform_indices = @transform_6, window_bounds = array<i64: 1, 8>}, {transform_indices = @transform_7, window_bounds = array<i64: 1, 16, 16, 16>}]} {
    %c0 = arith.constant 0 : index
    %c0_0 = arith.constant 0 : index
    %c0_1 = arith.constant 0 : index
    %c0_2 = arith.constant 0 : index
    %0 = vector.load %arg1[%c0, %c0_0, %c0_1, %c0_2] : memref<1x16x16x8xf32, #tpu.memory_space<vmem>>, vector<1x16x16x8xf32>
    %1 = vector.shape_cast %0 : vector<1x16x16x8xf32> to vector<256x8xf32>
    %2 = arith.truncf %1 : vector<256x8xf32> to vector<256x8xbf16>
    %c0_3 = arith.constant 0 : index
    %c0_4 = arith.constant 0 : index
    %3 = vector.load %arg2[%c0_3, %c0_4] : memref<8x4xbf16, #tpu.memory_space<vmem>>, vector<8x4xbf16>
    %cst = arith.constant dense<0.000000e+00> : vector<256x4xf32>
    %4 = tpu.matmul %2, %3, %cst {dimension_numbers = #tpu.dot_dimension_numbers<[1], [0], [0], [1], [0, 0, 1, 1], [], []>} : vector<256x8xbf16>, vector<8x4xbf16>, vector<256x4xf32> -> vector<256x4xf32>
    %c0_5 = arith.constant 0 : index
    %c0_6 = arith.constant 0 : index
    %5 = vector.load %arg3[%c0_5, %c0_6] : memref<1x4xf32, #tpu.memory_space<vmem>>, vector<1x4xf32>
    %6 = vector.broadcast %5 : vector<1x4xf32> to vector<256x4xf32>
    %7 = arith.addf %4, %6 : vector<256x4xf32>
    %cst_7 = arith.constant 0.000000e+00 : f32
    %8 = vector.broadcast %cst_7 : f32 to vector<256x4xf32>
    %9 = arith.maximumf %7, %8 : vector<256x4xf32>
    %10 = arith.truncf %9 : vector<256x4xf32> to vector<256x4xbf16>
    %11 = vector.shape_cast %10 : vector<256x4xbf16> to vector<1x16x16x4xbf16>
    %cst_8 = arith.constant 0.000000e+00 : bf16
    %12 = vector.broadcast %cst_8 : bf16 to vector<1x16x1x4xbf16>
    %13 = tpu.concatenate %12, %11, %12 in 2 : vector<1x16x1x4xbf16>, vector<1x16x16x4xbf16>, vector<1x16x1x4xbf16> -> vector<1x16x18x4xbf16>
    %cst_9 = arith.constant 0.000000e+00 : bf16
    %14 = vector.broadcast %cst_9 : bf16 to vector<1x1x18x4xbf16>
    %15 = tpu.concatenate %14, %13, %14 in 1 : vector<1x1x18x4xbf16>, vector<1x16x18x4xbf16>, vector<1x1x18x4xbf16> -> vector<1x18x18x4xbf16>
    %16 = vector.extract_strided_slice %15 {offsets = [0, 1, 1, 0], sizes = [1, 16, 16, 4], strides = [1, 1, 1, 1]} : vector<1x18x18x4xbf16> to vector<1x16x16x4xbf16>
    %17 = vector.shape_cast %16 : vector<1x16x16x4xbf16> to vector<256x4xbf16>
    %c0_10 = arith.constant 0 : index
    %c0_11 = arith.constant 0 : index
    %18 = vector.load %arg4[%c0_10, %c0_11] : memref<4x8xbf16, #tpu.memory_space<vmem>>, vector<4x8xbf16>
    %cst_12 = arith.constant dense<0.000000e+00> : vector<256x8xf32>
    %19 = tpu.matmul %17, %18, %cst_12 {dimension_numbers = #tpu.dot_dimension_numbers<[1], [0], [0], [1], [0, 0, 1, 1], [], []>} : vector<256x4xbf16>, vector<4x8xbf16>, vector<256x8xf32> -> vector<256x8xf32>
    %c0_13 = arith.constant 0 : index
    %c0_14 = arith.constant 0 : index
    %20 = vector.load %arg5[%c0_13, %c0_14] : memref<1x8xf32, #tpu.memory_space<vmem>>, vector<1x8xf32>
    %21 = vector.broadcast %20 : vector<1x8xf32> to vector<256x8xf32>
    %22 = arith.addf %19, %21 : vector<256x8xf32>
    %cst_15 = arith.constant 0.000000e+00 : f32
    %23 = vector.broadcast %cst_15 : f32 to vector<256x8xf32>
    %24 = arith.maximumf %22, %23 : vector<256x8xf32>
    %25 = vector.extract_strided_slice %15 {offsets = [0, 0, 0, 0], sizes = [1, 16, 16, 4], strides = [1, 1, 1, 1]} : vector<1x18x18x4xbf16> to vector<1x16x16x4xbf16>
    %26 = vector.shape_cast %25 : vector<1x16x16x4xbf16> to vector<256x4xbf16>
    %27 = vector.extract_strided_slice %15 {offsets = [0, 0, 1, 0], sizes = [1, 16, 16, 4], strides = [1, 1, 1, 1]} : vector<1x18x18x4xbf16> to vector<1x16x16x4xbf16>
    %28 = vector.shape_cast %27 : vector<1x16x16x4xbf16> to vector<256x4xbf16>
    %29 = vector.extract_strided_slice %15 {offsets = [0, 0, 2, 0], sizes = [1, 16, 16, 4], strides = [1, 1, 1, 1]} : vector<1x18x18x4xbf16> to vector<1x16x16x4xbf16>
    %30 = vector.shape_cast %29 : vector<1x16x16x4xbf16> to vector<256x4xbf16>
    %31 = vector.extract_strided_slice %15 {offsets = [0, 1, 0, 0], sizes = [1, 16, 16, 4], strides = [1, 1, 1, 1]} : vector<1x18x18x4xbf16> to vector<1x16x16x4xbf16>
    %32 = vector.shape_cast %31 : vector<1x16x16x4xbf16> to vector<256x4xbf16>
    %33 = vector.extract_strided_slice %15 {offsets = [0, 1, 1, 0], sizes = [1, 16, 16, 4], strides = [1, 1, 1, 1]} : vector<1x18x18x4xbf16> to vector<1x16x16x4xbf16>
    %34 = vector.shape_cast %33 : vector<1x16x16x4xbf16> to vector<256x4xbf16>
    %35 = vector.extract_strided_slice %15 {offsets = [0, 1, 2, 0], sizes = [1, 16, 16, 4], strides = [1, 1, 1, 1]} : vector<1x18x18x4xbf16> to vector<1x16x16x4xbf16>
    %36 = vector.shape_cast %35 : vector<1x16x16x4xbf16> to vector<256x4xbf16>
    %37 = vector.extract_strided_slice %15 {offsets = [0, 2, 0, 0], sizes = [1, 16, 16, 4], strides = [1, 1, 1, 1]} : vector<1x18x18x4xbf16> to vector<1x16x16x4xbf16>
    %38 = vector.shape_cast %37 : vector<1x16x16x4xbf16> to vector<256x4xbf16>
    %39 = vector.extract_strided_slice %15 {offsets = [0, 2, 1, 0], sizes = [1, 16, 16, 4], strides = [1, 1, 1, 1]} : vector<1x18x18x4xbf16> to vector<1x16x16x4xbf16>
    %40 = vector.shape_cast %39 : vector<1x16x16x4xbf16> to vector<256x4xbf16>
    %41 = vector.extract_strided_slice %15 {offsets = [0, 2, 2, 0], sizes = [1, 16, 16, 4], strides = [1, 1, 1, 1]} : vector<1x18x18x4xbf16> to vector<1x16x16x4xbf16>
    %42 = vector.shape_cast %41 : vector<1x16x16x4xbf16> to vector<256x4xbf16>
    %43 = tpu.concatenate %26, %28, %30, %32, %34, %36, %38, %40, %42 in 1 : vector<256x4xbf16>, vector<256x4xbf16>, vector<256x4xbf16>, vector<256x4xbf16>, vector<256x4xbf16>, vector<256x4xbf16>, vector<256x4xbf16>, vector<256x4xbf16>, vector<256x4xbf16> -> vector<256x36xbf16>
    %c0_16 = arith.constant 0 : index
    %c0_17 = arith.constant 0 : index
    %44 = vector.load %arg6[%c0_16, %c0_17] : memref<36x8xbf16, #tpu.memory_space<vmem>>, vector<36x8xbf16>
    %cst_18 = arith.constant dense<0.000000e+00> : vector<256x8xf32>
    %45 = tpu.matmul %43, %44, %cst_18 {dimension_numbers = #tpu.dot_dimension_numbers<[1], [0], [0], [1], [0, 0, 1, 1], [], []>} : vector<256x36xbf16>, vector<36x8xbf16>, vector<256x8xf32> -> vector<256x8xf32>
    %c0_19 = arith.constant 0 : index
    %c0_20 = arith.constant 0 : index
    %46 = vector.load %arg7[%c0_19, %c0_20] : memref<1x8xf32, #tpu.memory_space<vmem>>, vector<1x8xf32>
    %47 = vector.broadcast %46 : vector<1x8xf32> to vector<256x8xf32>
    %48 = arith.addf %45, %47 : vector<256x8xf32>
    %cst_21 = arith.constant 0.000000e+00 : f32
    %49 = vector.broadcast %cst_21 : f32 to vector<256x8xf32>
    %50 = arith.maximumf %48, %49 : vector<256x8xf32>
    %51 = tpu.concatenate %24, %50 in 1 : vector<256x8xf32>, vector<256x8xf32> -> vector<256x16xf32>
    %52 = vector.shape_cast %51 : vector<256x16xf32> to vector<1x16x16x16xf32>
    %c0_22 = arith.constant 0 : index
    %c0_23 = arith.constant 0 : index
    %c0_24 = arith.constant 0 : index
    %c0_25 = arith.constant 0 : index
    %53 = vector.load %arg8[%c0_22, %c0_23, %c0_24, %c0_25] : memref<1x16x16x16xf32, #tpu.memory_space<vmem>>, vector<1x16x16x16xf32>
    tpu.vector_store %arg8[%c0_22, %c0_23, %c0_24, %c0_25], %52 {strides = array<i32>} : memref<1x16x16x16xf32, #tpu.memory_space<vmem>>, vector<1x16x16x16xf32>,
    return
  }
  func.func @transform_0(%arg0: i32) -> (i32, i32, i32, i32) {
    %c0_i32 = arith.constant 0 : i32
    %c0_i32_0 = arith.constant 0 : i32
    %c0_i32_1 = arith.constant 0 : i32
    %c0_i32_2 = arith.constant 0 : i32
    return %arg0, %c0_i32, %c0_i32_0, %c0_i32_1 : i32, i32, i32, i32
  }
  func.func @transform_1(%arg0: i32) -> (i32, i32) {
    %c0_i32 = arith.constant 0 : i32
    %c0_i32_0 = arith.constant 0 : i32
    %c0_i32_1 = arith.constant 0 : i32
    return %c0_i32, %c0_i32_0 : i32, i32
  }
  func.func @transform_2(%arg0: i32) -> (i32, i32) {
    %c0_i32 = arith.constant 0 : i32
    %c0_i32_0 = arith.constant 0 : i32
    %c0_i32_1 = arith.constant 0 : i32
    return %c0_i32, %c0_i32_0 : i32, i32
  }
  func.func @transform_3(%arg0: i32) -> (i32, i32) {
    %c0_i32 = arith.constant 0 : i32
    %c0_i32_0 = arith.constant 0 : i32
    %c0_i32_1 = arith.constant 0 : i32
    return %c0_i32, %c0_i32_0 : i32, i32
  }
  func.func @transform_4(%arg0: i32) -> (i32, i32) {
    %c0_i32 = arith.constant 0 : i32
    %c0_i32_0 = arith.constant 0 : i32
    %c0_i32_1 = arith.constant 0 : i32
    return %c0_i32, %c0_i32_0 : i32, i32
  }
  func.func @transform_5(%arg0: i32) -> (i32, i32) {
    %c0_i32 = arith.constant 0 : i32
    %c0_i32_0 = arith.constant 0 : i32
    %c0_i32_1 = arith.constant 0 : i32
    return %c0_i32, %c0_i32_0 : i32, i32
  }
  func.func @transform_6(%arg0: i32) -> (i32, i32) {
    %c0_i32 = arith.constant 0 : i32
    %c0_i32_0 = arith.constant 0 : i32
    %c0_i32_1 = arith.constant 0 : i32
    return %c0_i32, %c0_i32_0 : i32, i32
  }
  func.func @transform_7(%arg0: i32) -> (i32, i32, i32, i32) {
    %c0_i32 = arith.constant 0 : i32
    %c0_i32_0 = arith.constant 0 : i32
    %c0_i32_1 = arith.constant 0 : i32
    %c0_i32_2 = arith.constant 0 : i32
    return %arg0, %c0_i32, %c0_i32_0, %c0_i32_1 : i32, i32, i32, i32
  }
}

</mosaic_0001>

<bundles_post_ra>
// kernel: tpu_custom_call.1
= control target key start
LH: loop header
LB: loop body
LE: loop exit
PB: predicated region body
PF: predicated region fallthrough
CT: control target
= control target key end

     0   :  { %12 = vsyncpa [#allocation3], 0  ;;  %s3710_s0 = inlined_call_operand.vmem [shape: f32[2,16,16,8], index: 0, kind: input, shape index: {}]   ;;  %s3711_s1 = inlined_call_operand.vmem [shape: bf16[8,4], index: 1, kind: input, shape index: {}]   ;;  %s3712_s2 = inlined_call_operand.vmem [shape: f32[1,4], index: 2, kind: input, shape index: {}]   ;;  %s3713_s3 = inlined_call_operand.vmem [shape: bf16[4,8], index: 3, kind: input, shape index: {}]   ;;  %s3714_s4 = inlined_call_operand.vmem [shape: f32[1,8], index: 4, kind: input, shape index: {}]   ;;  %s3715_s5 = inlined_call_operand.vmem [shape: bf16[36,8], index: 5, kind: input, shape index: {}]   ;;  %s3716_s6 = inlined_call_operand.vmem [shape: f32[1,8], index: 6, kind: input, shape index: {}]   ;;  %s3717_s7 = inlined_call_operand.hbm [shape: f32[2,16,16,16], index: 7, kind: output, shape index: {}]  }
   0x1   :  { %14 = vsyncpa [#allocation3 + $0x1], 0  ;;  %s2473_s24 = smov 0   ;;  %s2475_s25 = smov 0  }
   0x2   :  { %s2477_s26 = smov 0   ;;  %s2479_s27 = smov 0  }
   0x3 LB: > { %s2494_s28 = sadd.s32 4294967295, %s2421_s27   ;;  %s2229_s29 = sadd.s32 4294967294, %s2421_s27   ;;  %s2421_s27 = sphi %s2479_s27, %s3725_s27   ;;  %s2417_s26 = sphi %s2477_s26, %s3724_s26   ;;  %s2413_s25 = sphi %s2475_s25, %s3723_s25   ;;  %s2409_s24 = sphi %s2473_s24, %s3722_s24  }
   0x4   : > { %s2498_s30 = sadd.s32 1, %s2421_s27   ;;  %s179_s8 = sadd.s32 1, %s2417_s26 }
   0x5   : > { %s176_s9 = ssub.s32 %s2421_s27, %s2498_s30  ;;  %p189_p0 = scmp.ne.s32.totalorder %s2417_s26, %s2413_s25 }
   0x6   : > { %p177_p1 = scmp.eq.s32.totalorder %s176_s9, 0  ;;  %p190_p2 = scmp.eq.s32.totalorder %s2494_s28, 1 }
   0x7   : > { %p195_p3 = scmp.ne.s32.totalorder %s2413_s25, %s2409_s24  ;;  %p196_p4 = scmp.eq.s32.totalorder %s2229_s29, 1 }
   0x8   : > { %s2509_s10 = scalar_select %p177_p1, %s2417_s26, %s179_s8  }
   0x9   : > { %p2511_p5 = por %p190_p2, %p189_p0  ;;  %p2515_p6 = por %p196_p4, %p195_p3 }
   0xa   : > { %p2232_p7 = scmp.ge.s32.totalorder %s2421_s27, 1  ;;  %p240_p8 = scmp.lt.s32.totalorder %s2421_s27, 3 }
   0xc   : > { %p241_p9 = pnand %p2232_p7, %p240_p8 }
   0xd   : > { %p272_p10 = scmp.lt.s32.totalorder (!%p241_p9), %s2494_s28, 1  ;;  %s2424_s20 = smov (!%p241_p9), 8  }
   0xe   : > { %244 = sbr.rel (%p241_p9) target bundleno = 905 (0x389), region = 48  ;;  %s2425_s21 = smov (!%p241_p9), 4  }
   0xf   : > { %s2426_s9 = smov (!%p241_p9), 12   ;;  %s2427_s13 = smov (!%p241_p9), 20  }
  0x10   : > { %s2428_s14 = smov (!%p241_p9), 32   ;;  %s2431_s17 = smov (!%p241_p9), 28  }
  0x11   : > { %s2300_s22 = sshll.u32 (!%p241_p9), %s2494_s28, 8 }
  0x13   : > { %v326_v0 = vld [vmem:[%s3711_s1] sm:$0xf]  ;;  %vm380_vm0 = vcmask 1043456   ;;  %s273_s15 = scalar_select %p272_p10, %s2494_s28, 1  ;;  %vm331_vm1 = vcmask 64512   ;;  %v2423_v29 = vmov 0  }
  0x14   : > { %v382_v1 = vsel %vm380_vm0, %v326_v0, 0  ;;  %v2559_v30 = vrot.slane %v2423_v29, 1  ;;  %v989_v34 = vld [vmem:[%s3713_s3] sm:$0x3]  ;;  %vm1043_vm2 = vcmask 1041408   ;;  %vm761_vm3 = vcmask 1040384   ;;  %s2163_s28 = scalar_lea.hbm %s3717_s7, %s2300_s22 }
  0x15   : > { %391 = vmatpush.bf16.msra.mxu0 %v382_v1  ;;  %2301 = vmatpush.bf16.msra.mxu3 %v382_v1  ;;  %s2297_s16 = sshll.u32 %s273_s15, 8  ;;  %v1045_v37 = vsel %vm1043_vm2, %v989_v34, 0  ;;  %v2577_v39 = vld [vmem:[%s3712_s2] ss:$0 sm:$0xff]  ;;  %vm762_vm4 = vsmask.f32 256 }
  0x16   : > { %s2529_s19 = scalar_lea.vmem %s3710_s0, %s2297_s16  ;;  %1292 = vrot.lane.b32.xlu1 %v2559_v30, %s2424_s20  ;;  %1260 = vrot.lane.b32.xlu0 %v2559_v30, %s2425_s21  ;;  %vm2585_vm5 = vmand %vm761_vm3, %vm762_vm4  ;;  %vm1207_vm6 = vcmask 1046528   ;;  %vm796_vm7 = vsmask.f32 7424  ;;  %vm994_vm8 = vcmask 31744   ;;  %s2429_s15 = smov 24   ;;  %vm1580_vm9 = vcmask 97280  }
  0x17   : > { %v278_v2 = vld [vmem:[%s2529_s19] sm:$0xff]  ;;  %v279_v3 = vld [vmem:[%s2529_s19 + $0x8] sm:$0xff]  ;;  %v304_v4 = vld [vmem:[%s2529_s19 + $0xd0] sm:$0xff]  ;;  %1054 = vmatpush.bf16.msra.mxu1 %v1045_v37  ;;  %s2430_s16 = smov 16   ;;  %vm1613_vm10 = vcmask 130048   ;;  %vm1646_vm11 = vcmask 162816  }
  0x18   : > { %v310_v5 = vpack.c.bf16 %v279_v3, %v278_v2  ;;  %v305_v6 = vld [vmem:[%s2529_s19 + $0xd8] sm:$0xff]  ;;  %v280_v8 = vld [vmem:[%s2529_s19 + $0x10] sm:$0xff]  ;;  %v306_v10 = vld [vmem:[%s2529_s19 + $0xe0] sm:$0xff]  ;;  %vm1679_vm12 = vcmask 195584   ;;  %vm1712_vm13 = vcmask 228352   ;;  %vm1745_vm14 = vcmask 261120  }
  0x19   : > { %v323_v7 = vpack.c.bf16 %v305_v6, %v304_v4  ;;  %v281_v9 = vld [vmem:[%s2529_s19 + $0x18] sm:$0xff]  ;;  %v307_v11 = vld [vmem:[%s2529_s19 + $0xe8] sm:$0xff]  ;;  %v282_v14 = vld [vmem:[%s2529_s19 + $0x20] sm:$0xff]  ;;  %2302 = vmatpush.bf16.msrb.mxu3 %v1045_v37  ;;  %vm1802_vm15 = vcmask 293888   ;;  %s2166_s18 = sshll.u32 %s2163_s28, 4  ;;  %s2167_s18 = int_to_ptr.hbm [resolvable:$true] %s2166_s18 }
  0x1a   : > { %2236 = vmatmul.msk.bf16.vlgmr.msra.gmra.mxu0 %vm331_vm1, %v310_v5  ;;  %v311_v12 = vpack.c.bf16 %v281_v9, %v280_v8  ;;  %v324_v13 = vpack.c.bf16 %v307_v11, %v306_v10  ;;  %v283_v15 = vld [vmem:[%s2529_s19 + $0x28] sm:$0xff]  ;;  %v284_v17 = vld [vmem:[%s2529_s19 + $0x30] sm:$0xff]  ;;  %v285_v18 = vld [vmem:[%s2529_s19 + $0x38] sm:$0xff] }
  0x1b   : > { %2249 = vmatmul.msk.bf16.vlgmr.msra.gmra.mxu3 %vm331_vm1, %v323_v7  ;;  %v312_v16 = vpack.c.bf16 %v283_v15, %v282_v14  ;;  %v313_v19 = vpack.c.bf16 %v285_v18, %v284_v17  ;;  %v286_v20 = vld [vmem:[%s2529_s19 + $0x40] sm:$0xff]  ;;  %v287_v21 = vld [vmem:[%s2529_s19 + $0x48] sm:$0xff]  ;;  %v288_v23 = vld [vmem:[%s2529_s19 + $0x50] sm:$0xff] }
  0x1c   : > { %v314_v22 = vpack.c.bf16 %v287_v21, %v286_v20  ;;  %v289_v24 = vld [vmem:[%s2529_s19 + $0x58] sm:$0xff]  ;;  %v290_v26 = vld [vmem:[%s2529_s19 + $0x60] sm:$0xff]  ;;  %v291_v27 = vld [vmem:[%s2529_s19 + $0x68] sm:$0xff] }
  0x1d   : > { %v315_v25 = vpack.c.bf16 %v289_v24, %v288_v23  ;;  %v316_v28 = vpack.c.bf16 %v291_v27, %v290_v26  ;;  %v308_v31 = vld [vmem:[%s2529_s19 + $0xf0] sm:$0xff]  ;;  %v309_v32 = vld [vmem:[%s2529_s19 + $0xf8] sm:$0xff]  ;;  %v294_v2 = vld [vmem:[%s2529_s19 + $0x80] sm:$0xff] }
  0x1e   : > { %v325_v33 = vpack.c.bf16 %v309_v32, %v308_v31  ;;  %v292_v35 = vld [vmem:[%s2529_s19 + $0x70] sm:$0xff]  ;;  %v293_v36 = vld [vmem:[%s2529_s19 + $0x78] sm:$0xff]  ;;  %v295_v3 = vld [vmem:[%s2529_s19 + $0x88] sm:$0xff] }
  0x1f   : > { %v317_v38 = vpack.c.bf16 %v293_v36, %v292_v35  ;;  %v318_v6 = vpack.c.bf16 %v295_v3, %v294_v2 }
  0x2a   : > { %2237 = vmatmul.msk.bf16.gmra.mxu0 %vm331_vm1, %v311_v12 }
  0x2b   : > { %2250 = vmatmul.msk.bf16.gmra.mxu3 %vm331_vm1, %v324_v13 }
  0x3a   : > { %2238 = vmatmul.msk.bf16.gmra.mxu0 %vm331_vm1, %v312_v16 }
  0x3b   : > { %2251 = vmatmul.msk.bf16.gmra.mxu3 %vm331_vm1, %v325_v33 }
  0x4a   : > { %2239 = vmatmul.msk.bf16.gmra.mxu0 %vm331_vm1, %v313_v19 }
  0x5a   : > { %2240 = vmatmul.msk.bf16.gmra.mxu0 %vm331_vm1, %v314_v22 }
  0x6a   : > { %2241 = vmatmul.msk.bf16.gmra.mxu0 %vm331_vm1, %v315_v25 }
  0x7a   : > { %2242 = vmatmul.msk.bf16.gmra.mxu0 %vm331_vm1, %v316_v28 }
  0x8a   : > { %2243 = vmatmul.msk.bf16.gmra.mxu0 %vm331_vm1, %v317_v38 }
  0x97   : > { %v393_v40 = vpop.f32.mrf.mxu0 }
  0x98   : > { %v394_v41 = vadd.f32 %v2577_v39, %v393_v40 }
  0x9a   : > { %v473_v42 = vmax.f32 %v394_v41, 0.0  ;;  %2244 = vmatmul.msk.bf16.gmra.mxu0 %vm331_vm1, %v318_v6 }
  0x9c   : > { %v505_v47 = vpack.c.bf16 %v473_v42, %v473_v42 }
  0x9e   : > { %v458_v43 = vpop.f32.mrf.mxu3  ;;  %v569_v51 = vunpack.c.l.b16 %v505_v47 }
  0x9f   : > { %v395_v44 = vpop.f32.mrf.mxu0  ;;  %v459_v46 = vadd.f32 %v2577_v39, %v458_v43 }
  0xa0   : > { %v396_v45 = vadd.f32 %v2577_v39, %v395_v44 }
  0xa1   : > { %v499_v50 = vmax.f32 %v459_v46, 0.0 }
  0xa2   : > { %v474_v48 = vmax.f32 %v396_v45, 0.0 }
  0xa3   : > { %v531_v58 = vpack.c.bf16 %v499_v50, %v499_v50 }
  0xa4   : > { %v506_v49 = vpack.c.bf16 %v474_v48, %v474_v48 }
  0xa5   : > { %v595_v4 = vunpack.c.l.b16 %v531_v58 }
  0xa6   : > { %v570_v52 = vunpack.c.l.b16 %v506_v49  ;;  %v460_v53 = vpop.f32.mrf.mxu3 }
  0xa7   : > { %v461_v54 = vadd.f32 %v2577_v39, %v460_v53  ;;  %v398_v55 = vpop.f32.mrf.mxu0 }
  0xa8   : > { %v601_v56 = vpack.c.b16 %v570_v52, %v569_v51  ;;  %v399_v57 = vadd.f32 %v2577_v39, %v398_v55 }
  0xa9   : > { %v500_v59 = vmax.f32 %v461_v54, 0.0 }
  0xaa   : > { %v618_v60 = vshrl.u32 %v601_v56, 16  ;;  %v621_v0 = vshll.u32 %v601_v56, 16  ;;  %v475_v1 = vmax.f32 %v399_v57, 0.0 }
  0xab   : > { %v532_v61 = vpack.c.bf16 %v500_v59, %v500_v59 }
  0xac   : > { %v620_v63 = vrot.slane %v618_v60, 7  ;;  %v507_v13 = vpack.c.bf16 %v475_v1, %v475_v1  ;;  %v296_v60 = vld [vmem:[%s2529_s19 + $0x90] sm:$0xff] }
  0xad   : > { %v596_v5 = vunpack.c.l.b16 %v532_v61  ;;  %v297_v61 = vld [vmem:[%s2529_s19 + $0x98] sm:$0xff] }
  0xae   : > { %v623_v7 = vor.u32 %v621_v0, %v620_v63  ;;  %v780_v8 = vsel %vm2585_vm5, %v620_v63, 0  ;;  %v463_v9 = vpop.f32.mrf.mxu3  ;;  %v571_v26 = vunpack.c.l.b16 %v507_v13  ;;  %v319_v2 = vpack.c.bf16 %v297_v61, %v296_v60 }
  0xaf   : > { %v614_v10 = vpack.c.b16 %v596_v5, %v595_v4  ;;  %v400_v11 = vpop.f32.mrf.mxu0  ;;  %v464_v12 = vadd.f32 %v2577_v39, %v463_v9  ;;  %v1211_v18 = vrot.slane %v780_v8, 1  ;;  %v805_v21 = vshll.u32 %v780_v8, 16 }
  0xb0   : > { %v401_v14 = vadd.f32 %v2577_v39, %v400_v11  ;;  %v2598_v15 = vsel %vm2585_vm5, 0, %v623_v7  ;;  %2245 = vmatmul.msk.bf16.gmra.mxu0 %vm331_vm1, %v319_v2 }
  0xb1   : > { %v709_v16 = vshrl.u32 %v614_v10, 16  ;;  %1324 = vrot.lane.b32.xlu1 %v2598_v15, %s2426_s9  ;;  %v1210_v17 = vrot.slane %v2598_v15, 1  ;;  %v800_v20 = vshll.u32 %v2598_v15, 16  ;;  %v712_v23 = vshll.u32 %v614_v10, 16 }
  0xb2   : > { %v476_v19 = vmax.f32 %v401_v14, 0.0  ;;  %v501_v25 = vmax.f32 %v464_v12, 0.0  ;;  %v798_v28 = vshrl.u32 %v2598_v15, 16  ;;  %v807_v36 = vrot.slane %v805_v21, 1 }
  0xb3   : > { %v711_v22 = vrot.slane %v709_v16, 7  ;;  %v1212_v24 = vsel %vm1207_vm6, %v1210_v17, %v1211_v18  ;;  %v802_v31 = vrot.slane %v800_v20, 1 }
  0xb4   : > { %v508_v27 = vpack.c.bf16 %v476_v19, %v476_v19  ;;  %1388 = vrot.lane.b32.xlu0 %v1212_v24, %s2427_s13  ;;  %1294 = vrot.lane.b32.xlu2 %v1212_v24, %s2424_s20  ;;  %v533_v40 = vpack.c.bf16 %v501_v25, %v501_v25 }
  0xb5   : > { %v714_v32 = vor.u32 %v712_v23, %v711_v22  ;;  %v793_v33 = vsel %vm2585_vm5, %v711_v22, 0  ;;  %v803_v35 = vor.u32 %v802_v31, %v798_v28 }
  0xb6   : > { %v572_v34 = vunpack.c.l.b16 %v508_v27  ;;  %v465_v37 = vpop.f32.mrf.mxu3  ;;  %v1250_v46 = vrot.slane %v793_v33, 1  ;;  %v961_v47 = vshll.u32 %v793_v33, 16  ;;  %v597_v54 = vunpack.c.l.b16 %v533_v40 }
  0xb7   : > { %v2612_v38 = vsel %vm2585_vm5, 0, %v714_v32  ;;  %v466_v41 = vadd.f32 %v2577_v39, %v465_v37  ;;  %v403_v42 = vpop.f32.mrf.mxu0  ;;  %v808_v44 = vsel %vm796_vm7, %v803_v35, %v807_v36 }
  0xb8   : > { %v602_v43 = vpack.c.b16 %v572_v34, %v571_v26  ;;  %v1249_v45 = vrot.slane %v2612_v38, 1  ;;  %2252 = vmatmul.msk.bf16.vlgmr.msra.gmra.mxu1 %vm994_vm8, %v808_v44  ;;  %v956_v49 = vshll.u32 %v2612_v38, 16  ;;  %v404_v50 = vadd.f32 %v2577_v39, %v403_v42 }
  0xb9   : > { %v502_v48 = vmax.f32 %v466_v41, 0.0  ;;  %v954_v56 = vshrl.u32 %v2612_v38, 16  ;;  %v963_v1 = vrot.slane %v961_v47, 1  ;;  %v299_v47 = vld [vmem:[%s2529_s19 + $0xa8] sm:$0xff] }
  0xba   : > { %v625_v51 = vshrl.u32 %v602_v43, 16  ;;  %v628_v52 = vshll.u32 %v602_v43, 16  ;;  %v1251_v53 = vsel %vm1207_vm6, %v1249_v45, %v1250_v46  ;;  %v958_v57 = vrot.slane %v956_v49, 1  ;;  %v298_v46 = vld [vmem:[%s2529_s19 + $0xa0] sm:$0xff] }
  0xbb   : > { %1508 = vrot.lane.b32.xlu1 %v1251_v53, %s2428_s14  ;;  %v534_v55 = vpack.c.bf16 %v502_v48, %v502_v48  ;;  %v477_v59 = vmax.f32 %v404_v50, 0.0  ;;  %v320_v48 = vpack.c.bf16 %v299_v47, %v298_v46 }
  0xbc   : > { %v627_v58 = vrot.slane %v625_v51, 7  ;;  %1444 = vrot.lane.b32.xlu0 %v2612_v38, %s2429_s15  ;;  %1350 = vrot.lane.b32.xlu2 %v2612_v38, %s2426_s9  ;;  %v959_v0 = vor.u32 %v958_v57, %v954_v56 }
  0xbd   : > { %v598_v63 = vunpack.c.l.b16 %v534_v55  ;;  %v509_v10 = vpack.c.bf16 %v477_v59, %v477_v59 }
  0xbe   : > { %v630_v3 = vor.u32 %v628_v52, %v627_v58  ;;  %v2631_v4 = vsel %vm2585_vm5, %v627_v58, 0  ;;  %v2634_v6 = vsel %vm796_vm7, %v959_v0, %v963_v1 }
  0xbf   : > { %v615_v5 = vpack.c.b16 %v598_v63, %v597_v54  ;;  %v817_v7 = vshll.u32 %v2631_v4, 16  ;;  %v405_v8 = vpop.f32.mrf.mxu0  ;;  %2265 = vmatmul.msk.bf16.vlgmr.msrb.gmra.mxu3 %vm994_vm8, %v2634_v6  ;;  %v573_v21 = vunpack.c.l.b16 %v509_v10  ;;  %v1214_v54 = vrot.slane %v2631_v4, 1 }
  0xc0   : > { %v2640_v9 = vsel %vm2585_vm5, 0, %v630_v3  ;;  %v406_v11 = vadd.f32 %v2577_v39, %v405_v8  ;;  %2246 = vmatmul.msk.bf16.gmra.mxu0 %vm331_vm1, %v320_v48 }
  0xc1   : > { %v716_v12 = vshrl.u32 %v615_v5, 16  ;;  %v719_v13 = vshll.u32 %v615_v5, 16  ;;  %v810_v14 = vshrl.u32 %v2640_v9, 16  ;;  %v812_v16 = vshll.u32 %v2640_v9, 16 }
  0xc2   : > { %v478_v17 = vmax.f32 %v406_v11, 0.0  ;;  %v819_v20 = vrot.slane %v817_v7, 1  ;;  %v1213_v52 = vrot.slane %v2640_v9, 1 }
  0xc3   : > { %v718_v18 = vrot.slane %v716_v12, 7  ;;  %1382 = vrot.lane.b32.xlu1 %v2634_v6, %s2430_s16  ;;  %v814_v19 = vrot.slane %v812_v16, 1 }
  0xc4   : > { %1356 = vrot.lane.b32.xlu2 %v808_v44, %s2430_s16  ;;  %1262 = vrot.lane.b32.xlu0 %v808_v44, %s2425_s21  ;;  %v510_v22 = vpack.c.bf16 %v478_v17, %v478_v17  ;;  %v1215_v63 = vsel %vm1207_vm6, %v1213_v52, %v1214_v54  ;;  %v300_v17 = vld [vmem:[%s2529_s19 + $0xb0] sm:$0xff] }
  0xc5   : > { %v721_v23 = vor.u32 %v719_v13, %v718_v18  ;;  %v2653_v24 = vsel %vm2585_vm5, %v718_v18, 0  ;;  %v815_v25 = vor.u32 %v814_v19, %v810_v14  ;;  %v301_v18 = vld [vmem:[%s2529_s19 + $0xb8] sm:$0xff] }
  0xc6   : > { %v574_v26 = vunpack.c.l.b16 %v510_v22  ;;  %v973_v27 = vshll.u32 %v2653_v24, 16  ;;  %v321_v19 = vpack.c.bf16 %v301_v18, %v300_v17 }
  0xc7   : > { %v2658_v28 = vsel %vm2585_vm5, 0, %v721_v23  ;;  %v2661_v31 = vsel %vm796_vm7, %v815_v25, %v819_v20  ;;  %v408_v32 = vpop.f32.mrf.mxu0 }
  0xc8   : > { %v603_v33 = vpack.c.b16 %v574_v26, %v573_v21  ;;  %v966_v34 = vshrl.u32 %v2658_v28, 16  ;;  %v968_v35 = vshll.u32 %v2658_v28, 16  ;;  %2253 = vmatmul.msk.bf16.gmra.mxu1 %vm994_vm8, %v2661_v31  ;;  %v409_v36 = vadd.f32 %v2577_v39, %v408_v32 }
  0xc9   : > { %v975_v42 = vrot.slane %v973_v27, 1 }
  0xca   : > { %v632_v37 = vshrl.u32 %v603_v33, 16  ;;  %v635_v40 = vshll.u32 %v603_v33, 16  ;;  %v970_v41 = vrot.slane %v968_v35, 1  ;;  %v479_v45 = vmax.f32 %v409_v36, 0.0 }
  0xcb   : > { %1420 = vrot.lane.b32.xlu1 %v2640_v9, %s2429_s15 }
  0xcc   : > { %1320 = vrot.lane.b32.xlu2 %v1251_v53, %s2424_s20  ;;  %1414 = vrot.lane.b32.xlu0 %v1251_v53, %s2427_s13  ;;  %v634_v43 = vrot.slane %v632_v37, 7  ;;  %v971_v44 = vor.u32 %v970_v41, %v966_v34  ;;  %v511_v57 = vpack.c.bf16 %v479_v45, %v479_v45 }
  0xce   : > { %v637_v49 = vor.u32 %v635_v40, %v634_v43  ;;  %v2676_v50 = vsel %vm2585_vm5, %v634_v43, 0  ;;  %v2679_v51 = vsel %vm796_vm7, %v971_v44, %v975_v42  ;;  %v575_v2 = vunpack.c.l.b16 %v511_v57  ;;  %v303_v57 = vld [vmem:[%s2529_s19 + $0xc8] sm:$0xff] }
  0xcf   : > { %v410_v55 = vpop.f32.mrf.mxu0  ;;  %v829_v53 = vshll.u32 %v2676_v50, 16  ;;  %2266 = vmatmul.msk.bf16.gmra.mxu3 %vm994_vm8, %v2679_v51  ;;  %v1252_v42 = vrot.slane %v2658_v28, 1  ;;  %v1253_v43 = vrot.slane %v2653_v24, 1  ;;  %v1217_v17 = vrot.slane %v2676_v50, 1 }
  0xd0   : > { %v2687_v56 = vsel %vm2585_vm5, 0, %v637_v49  ;;  %v411_v58 = vadd.f32 %v2577_v39, %v410_v55  ;;  %2247 = vmatmul.msk.bf16.gmra.mxu0 %vm331_vm1, %v321_v19 }
  0xd1   : > { %v822_v59 = vshrl.u32 %v2687_v56, 16  ;;  %v824_v60 = vshll.u32 %v2687_v56, 16  ;;  %v831_v1 = vrot.slane %v829_v53, 1  ;;  %v2741_v48 = vsel %vm1207_vm6, %v1252_v42, %v1253_v43  ;;  %v302_v53 = vld [vmem:[%s2529_s19 + $0xc0] sm:$0xff] }
  0xd2   : > { %v480_v61 = vmax.f32 %v411_v58, 0.0  ;;  %v322_v58 = vpack.c.bf16 %v303_v57, %v302_v53 }
  0xd3   : > { %1326 = vrot.lane.b32.xlu1 %v2640_v9, %s2426_s9  ;;  %v826_v0 = vrot.slane %v824_v60, 1 }
  0xd4   : > { %1288 = vrot.lane.b32.xlu2 %v2634_v6, %s2425_s21  ;;  %1296 = vrot.lane.b32.xlu0 %v1215_v63, %s2424_s20  ;;  %v512_v3 = vpack.c.bf16 %v480_v61, %v480_v61 }
  0xd5   : > { %v827_v4 = vor.u32 %v826_v0, %v822_v59 }
  0xd6   : > { %v576_v5 = vunpack.c.l.b16 %v512_v3 }
  0xd7   : > { %v2701_v7 = vsel %vm796_vm7, %v827_v4, %v831_v1  ;;  %v413_v8 = vpop.f32.mrf.mxu0 }
  0xd8   : > { %v604_v10 = vpack.c.b16 %v576_v5, %v575_v2  ;;  %v414_v11 = vadd.f32 %v2577_v39, %v413_v8  ;;  %2254 = vmatmul.msk.bf16.gmra.mxu1 %vm994_vm8, %v2701_v7 }
  0xda   : > { %v639_v12 = vshrl.u32 %v604_v10, 16  ;;  %v642_v13 = vshll.u32 %v604_v10, 16  ;;  %v481_v16 = vmax.f32 %v414_v11, 0.0 }
  0xdb   : > { %1352 = vrot.lane.b32.xlu1 %v2658_v28, %s2426_s9 }
  0xdc   : > { %1476 = vrot.lane.b32.xlu2 %v2634_v6, %s2431_s17  ;;  %1484 = vrot.lane.b32.xlu0 %v1215_v63, %s2428_s14  ;;  %v641_v14 = vrot.slane %v639_v12, 7  ;;  %v513_v6 = vpack.c.bf16 %v481_v16, %v481_v16  ;;  %v1216_v16 = vrot.slane %v2687_v56, 1 }
  0xde   : > { %v644_v20 = vor.u32 %v642_v13, %v641_v14  ;;  %v2715_v21 = vsel %vm2585_vm5, %v641_v14, 0  ;;  %v577_v36 = vunpack.c.l.b16 %v513_v6 }
  0xdf   : > { %v415_v22 = vpop.f32.mrf.mxu0  ;;  %v841_v32 = vshll.u32 %v2715_v21, 16 }
  0xe0   : > { %v2720_v23 = vsel %vm2585_vm5, 0, %v644_v20  ;;  %v416_v25 = vadd.f32 %v2577_v39, %v415_v22  ;;  %2248 = vmatmul.msk.bf16.gmra.mxu0 %vm331_vm1, %v322_v58  ;;  %v1218_v22 = vsel %vm1207_vm6, %v1216_v16, %v1217_v17 }
  0xe1   : > { %v834_v26 = vshrl.u32 %v2720_v23, 16  ;;  %v836_v27 = vshll.u32 %v2720_v23, 16  ;;  %v843_v35 = vrot.slane %v841_v32, 1  ;;  %v1220_v32 = vrot.slane %v2715_v21, 1 }
  0xe2   : > { %v482_v33 = vmax.f32 %v416_v25, 0.0 }
  0xe3   : > { %1264 = vrot.lane.b32.xlu1 %v2661_v31, %s2425_s21  ;;  %v838_v34 = vrot.slane %v836_v27, 1  ;;  %v1219_v27 = vrot.slane %v2720_v23, 1 }
  0xe4   : > { %1446 = vrot.lane.b32.xlu2 %v2658_v28, %s2429_s15  ;;  %1390 = vrot.lane.b32.xlu0 %v1215_v63, %s2427_s13  ;;  %v514_v37 = vpack.c.bf16 %v482_v33, %v482_v33 }
  0xe5   : > { %v839_v40 = vor.u32 %v838_v34, %v834_v26 }
  0xe6   : > { %v578_v41 = vunpack.c.l.b16 %v514_v37 }
  0xe7   : > { %v2734_v44 = vsel %vm796_vm7, %v839_v40, %v843_v35  ;;  %v418_v49 = vpop.f32.mrf.mxu0  ;;  %v1221_v40 = vsel %vm1207_vm6, %v1219_v27, %v1220_v32 }
  0xe8   : > { %v605_v45 = vpack.c.b16 %v578_v41, %v577_v36  ;;  %2255 = vmatmul.msk.bf16.gmra.mxu1 %vm994_vm8, %v2734_v44  ;;  %v419_v52 = vadd.f32 %v2577_v39, %v418_v49 }
  0xea   : > { %v646_v46 = vshrl.u32 %v605_v45, 16  ;;  %v649_v47 = vshll.u32 %v605_v45, 16  ;;  %v483_v60 = vmax.f32 %v419_v52, 0.0 }
  0xeb   : > { %1478 = vrot.lane.b32.xlu1 %v2679_v51, %s2431_s17 }
  0xec   : > { %1452 = vrot.lane.b32.xlu2 %v2661_v31, %s2431_s17  ;;  %1510 = vrot.lane.b32.xlu0 %v2741_v48, %s2428_s14  ;;  %v648_v24 = vrot.slane %v646_v46, 7  ;;  %v515_v4 = vpack.c.bf16 %v483_v60, %v483_v60 }
  0xee   : > { %v651_v54 = vor.u32 %v649_v47, %v648_v24  ;;  %v2750_v55 = vsel %vm2585_vm5, %v648_v24, 0  ;;  %v579_v12 = vunpack.c.l.b16 %v515_v4 }
  0xef   : > { %v853_v0 = vshll.u32 %v2750_v55, 16  ;;  %v420_v1 = vpop.f32.mrf.mxu0 }
  0xf0   : > { %v2756_v59 = vsel %vm2585_vm5, 0, %v651_v54  ;;  %v421_v5 = vadd.f32 %v2577_v39, %v420_v1 }
  0xf1   : > { %v846_v61 = vshrl.u32 %v2756_v59, 16  ;;  %v848_v63 = vshll.u32 %v2756_v59, 16  ;;  %v855_v3 = vrot.slane %v853_v0, 1 }
  0xf2   : > { %v484_v10 = vmax.f32 %v421_v5, 0.0 }
  0xf3   : > { %1422 = vrot.lane.b32.xlu1 %v2687_v56, %s2429_s15  ;;  %v850_v2 = vrot.slane %v848_v63, 1  ;;  %v2822_v63 = vpop.permute.xlu1 %1292 }
  0xf4   : > { %1358 = vrot.lane.b32.xlu2 %v2661_v31, %s2430_s16  ;;  %1290 = vrot.lane.b32.xlu0 %v2679_v51, %s2425_s21  ;;  %v516_v13 = vpack.c.bf16 %v484_v10, %v484_v10 }
  0xf5   : > { %v851_v8 = vor.u32 %v850_v2, %v846_v61 }
  0xf6   : > { %v580_v14 = vunpack.c.l.b16 %v516_v13  ;;  %v1222_v13 = vrot.slane %v2756_v59, 1 }
  0xf7   : > { %v2770_v11 = vsel %vm796_vm7, %v851_v8, %v855_v3  ;;  %v423_v25 = vpop.f32.mrf.mxu0  ;;  %v2829_v3 = vpop.permute.xlu0 %1260 }
  0xf8   : > { %2256 = vmatmul.msk.bf16.gmra.mxu1 %vm994_vm8, %v2770_v11  ;;  %v606_v31 = vpack.c.b16 %v580_v14, %v579_v12  ;;  %v424_v50 = vadd.f32 %v2577_v39, %v423_v25  ;;  %v1223_v14 = vrot.slane %v2750_v55, 1 }
  0xfa   : > { %v653_v18 = vshrl.u32 %v606_v31, 16  ;;  %v656_v19 = vshll.u32 %v606_v31, 16  ;;  %v485_v34 = vmax.f32 %v424_v50, 0.0  ;;  %v1224_v27 = vsel %vm1207_vm6, %v1222_v13, %v1223_v14 }
  0xfb   : > { %1328 = vrot.lane.b32.xlu1 %v2687_v56, %s2426_s9 }
  0xfc   : > { %1454 = vrot.lane.b32.xlu2 %v2701_v7, %s2431_s17  ;;  %1384 = vrot.lane.b32.xlu0 %v2679_v51, %s2430_s16  ;;  %v655_v20 = vrot.slane %v653_v18, 7  ;;  %v517_v43 = vpack.c.bf16 %v485_v34, %v485_v34 }
  0xfe   : > { %v658_v6 = vor.u32 %v656_v19, %v655_v20  ;;  %v2794_v26 = vsel %vm2585_vm5, %v655_v20, 0  ;;  %v581_v49 = vunpack.c.l.b16 %v517_v43 }
  0xff   : > { %v865_v37 = vshll.u32 %v2794_v26, 16  ;;  %v425_v21 = vpop.f32.mrf.mxu0 }
 0x100   : > { %v2789_v51 = vsel %vm2585_vm5, 0, %v658_v6  ;;  %v426_v45 = vadd.f32 %v2577_v39, %v425_v21  ;;  %v1782_v6 = vld [vmem:[%s3715_s5 + $0x10] sm:$0x3] }
 0x101   : > { %v860_v33 = vshll.u32 %v2789_v51, 16  ;;  %v858_v35 = vshrl.u32 %v2789_v51, 16  ;;  %v867_v42 = vrot.slane %v865_v37, 1  ;;  %v1796_v50 = vunpack.c.l.b16 %v1782_v6 }
 0x102   : > { %v1225_v6 = vrot.slane %v2789_v51, 1 }
 0x103   : > { %1298 = vrot.lane.b32.xlu1 %v1218_v22, %s2424_s20  ;;  %v862_v36 = vrot.slane %v860_v33, 1 }
 0x104   : > { %1360 = vrot.lane.b32.xlu2 %v2701_v7, %s2430_s16  ;;  %1486 = vrot.lane.b32.xlu0 %v1218_v22, %s2428_s14 }
 0x105   : > { %v863_v41 = vor.u32 %v862_v36, %v858_v35  ;;  %v1799_v35 = vpack.c.b16 %v1796_v50, %v1796_v50 }
 0x107   : > { %v2808_v46 = vsel %vm796_vm7, %v863_v41, %v867_v42  ;;  %v428_v54 = vpop.f32.mrf.mxu0  ;;  %v1836_v42 = vsel %vm1043_vm2, %v1799_v35, 0 }
 0x108   : > { %2257 = vmatmul.msk.bf16.gmra.mxu1 %vm994_vm8, %v2808_v46  ;;  %v429_v57 = vadd.f32 %v2577_v39, %v428_v54  ;;  %1843 = vmatpush.bf16.msra.mxu2 %v1836_v42  ;;  %v2298_v54 = vld [vmem:[%s3715_s5] sm:$0xff] }
 0x109   : > { %2303 = vmatpush.bf16.msra.mxu3 %v1836_v42 }
 0x10a   : > { %v487_v1 = vmax.f32 %v429_v57, 0.0 }
 0x10b   : > { %1266 = vrot.lane.b32.xlu1 %v2701_v7, %s2425_s21  ;;  %v486_v7 = vmax.f32 %v426_v45, 0.0  ;;  %v2299_v45 = vld [vmem:[%s3715_s5 + $0x8] sm:$0xff] }
 0x10c   : > { %1300 = vrot.lane.b32.xlu2 %v1221_v40, %s2424_s20  ;;  %1392 = vrot.lane.b32.xlu0 %v1218_v22, %s2427_s13  ;;  %v519_v8 = vpack.c.bf16 %v487_v1, %v487_v1 }
 0x10d   : > { %v518_v24 = vpack.c.bf16 %v486_v7, %v486_v7  ;;  %1844 = vmatpush.bf16.msra.mxu2 %v2299_v45  ;;  %2304 = vmatpush.bf16.msra.mxu3 %v2299_v45 }
 0x10e   : > { %v2810_v47 = vpop.permute.xlu2 %1294  ;;  %v583_v18 = vunpack.c.l.b16 %v519_v8 }
 0x10f   : > { %v582_v52 = vunpack.c.l.b16 %v518_v24  ;;  %v430_v4 = vpop.f32.mrf.mxu0 }
 0x110   : > { %v431_v10 = vadd.f32 %v2577_v39, %v430_v4 }
 0x111   : > { %v607_v53 = vpack.c.b16 %v582_v52, %v581_v49  ;;  %1845 = vmatpush.bf16.msra.mxu2 %v2298_v54  ;;  %2305 = vmatpush.bf16.msra.mxu3 %v2298_v54 }
 0x112   : > { %v488_v16 = vmax.f32 %v431_v10, 0.0 }
 0x113   : > { %1424 = vrot.lane.b32.xlu1 %v2720_v23, %s2429_s15  ;;  %v660_v60 = vshrl.u32 %v607_v53, 16  ;;  %v663_v61 = vshll.u32 %v607_v53, 16 }
 0x114   : > { %1268 = vrot.lane.b32.xlu2 %v2734_v44, %s2425_s21  ;;  %1488 = vrot.lane.b32.xlu0 %v1221_v40, %s2428_s14  ;;  %v520_v19 = vpack.c.bf16 %v488_v16, %v488_v16 }
 0x115   : > { %v662_v0 = vrot.slane %v660_v60, 7 }
 0x116   : > { %v2820_v58 = vpop.permute.xlu2 %1350  ;;  %v584_v32 = vunpack.c.l.b16 %v520_v19 }
 0x117   : > { %v665_v2 = vor.u32 %v663_v61, %v662_v0  ;;  %v2842_v31 = vsel %vm2585_vm5, %v662_v0, 0  ;;  %v433_v52 = vpop.f32.mrf.mxu0 }
 0x118   : > { %v877_v25 = vshll.u32 %v2842_v31, 16  ;;  %v608_v36 = vpack.c.b16 %v584_v32, %v583_v18  ;;  %v434_v61 = vadd.f32 %v2577_v39, %v433_v52  ;;  %v1517_v52 = vsel %vm994_vm8, 0, %v2829_v3 }
 0x119   : > { %v2833_v5 = vsel %vm2585_vm5, 0, %v665_v2 }
 0x11a   : > { %v872_v17 = vshll.u32 %v2833_v5, 16  ;;  %v870_v20 = vshrl.u32 %v2833_v5, 16  ;;  %v879_v34 = vrot.slane %v877_v25, 1  ;;  %v667_v21 = vshrl.u32 %v608_v36, 16 }
 0x11b   : > { %1330 = vrot.lane.b32.xlu1 %v2720_v23, %s2426_s9  ;;  %v670_v43 = vshll.u32 %v608_v36, 16  ;;  %v489_v8 = vmax.f32 %v434_v61, 0.0  ;;  %v1226_v25 = vrot.slane %v2794_v26, 1 }
 0x11c   : > { %1456 = vrot.lane.b32.xlu2 %v2734_v44, %s2431_s17  ;;  %1394 = vrot.lane.b32.xlu0 %v1221_v40, %s2427_s13  ;;  %v874_v22 = vrot.slane %v872_v17, 1 }
 0x11d   : > { %v521_v19 = vpack.c.bf16 %v489_v8, %v489_v8 }
 0x11e   : > { %v2836_v12 = vpop.permute.xlu2 %1356  ;;  %v875_v33 = vor.u32 %v874_v22, %v870_v20 }
 0x11f   : > { %v435_v16 = vpop.f32.mrf.mxu0 }
 0x120   : > { %v2863_v41 = vsel %vm796_vm7, %v875_v33, %v879_v34  ;;  %v436_v20 = vadd.f32 %v2577_v39, %v435_v16  ;;  %v1227_v33 = vsel %vm1207_vm6, %v1225_v6, %v1226_v25 }
 0x121   : > { %2258 = vmatmul.msk.bf16.gmra.mxu1 %vm994_vm8, %v2863_v41 }
 0x122   : > { %v490_v50 = vmax.f32 %v436_v20, 0.0 }
 0x123   : > { %1426 = vrot.lane.b32.xlu1 %v2756_v59, %s2429_s15  ;;  %v2852_v55 = vpop.permute.xlu1 %1324 }
 0x124   : > { %1362 = vrot.lane.b32.xlu2 %v2734_v44, %s2430_s16  ;;  %1302 = vrot.lane.b32.xlu0 %v1224_v27, %s2424_s20  ;;  %v669_v44 = vrot.slane %v667_v21, 7  ;;  %v522_v32 = vpack.c.bf16 %v490_v50, %v490_v50 }
 0x126   : > { %v2858_v37 = vpop.permute.xlu0 %1388  ;;  %v2860_v40 = vpop.permute.xlu2 %1320  ;;  %v672_v7 = vor.u32 %v670_v43, %v669_v44  ;;  %v2891_v60 = vsel %vm2585_vm5, %v669_v44, 0  ;;  %v586_v34 = vunpack.c.l.b16 %v522_v32 }
 0x127   : > { %v889_v4 = vshll.u32 %v2891_v60, 16 }
 0x128   : > { %v2880_v24 = vsel %vm2585_vm5, 0, %v672_v7 }
 0x129   : > { %v884_v0 = vshll.u32 %v2880_v24, 16  ;;  %v882_v1 = vshrl.u32 %v2880_v24, 16  ;;  %v891_v13 = vrot.slane %v889_v4, 1 }
 0x12b   : > { %1332 = vrot.lane.b32.xlu1 %v2756_v59, %s2426_s9  ;;  %v886_v2 = vrot.slane %v884_v0, 1  ;;  %v1549_v0 = vsel %vm331_vm1, %v1517_v52, %v2822_v63 }
 0x12c   : > { %1270 = vrot.lane.b32.xlu2 %v2770_v11, %s2425_s21  ;;  %1490 = vrot.lane.b32.xlu0 %v1224_v27, %s2428_s14  ;;  %v1582_v4 = vsel %vm1580_vm9, %v1549_v0, %v2852_v55 }
 0x12d   : > { %v2876_v49 = vpop.permute.xlu1 %1508  ;;  %v887_v10 = vor.u32 %v886_v2, %v882_v1  ;;  %v438_v36 = vpop.f32.mrf.mxu0  ;;  %v1615_v25 = vsel %vm1613_vm10, %v1582_v4, %v2836_v12 }
 0x12e   : > { %v2885_v53 = vpop.permute.xlu0 %1444  ;;  %v2887_v57 = vpop.permute.xlu2 %1288  ;;  %v439_v45 = vadd.f32 %v2577_v39, %v438_v36 }
 0x12f   : > { %v2905_v17 = vsel %vm796_vm7, %v887_v10, %v891_v13  ;;  %v1545_v55 = vsel %vm994_vm8, %v2612_v38, %v2887_v57 }
 0x130   : > { %v491_v54 = vmax.f32 %v439_v45, 0.0  ;;  %v1577_v57 = vsel %vm331_vm1, %v1545_v55, %v2860_v40  ;;  %v1228_v40 = vrot.slane %v2833_v5, 1 }
 0x131   : > { %2259 = vmatmul.msk.bf16.gmra.mxu1 %vm994_vm8, %v2905_v17 }
 0x132   : > { %v523_v16 = vpack.c.bf16 %v491_v54, %v491_v54 }
 0x133   : > { %1428 = vrot.lane.b32.xlu1 %v2789_v51, %s2429_s15 }
 0x134   : > { %1458 = vrot.lane.b32.xlu2 %v2770_v11, %s2431_s17  ;;  %1396 = vrot.lane.b32.xlu0 %v1224_v27, %s2427_s13  ;;  %v585_v27 = vunpack.c.l.b16 %v521_v19 }
 0x135   : > { %v2902_v14 = vpop.permute.xlu1 %1382  ;;  %v440_v10 = vpop.f32.mrf.mxu0 }
 0x136   : > { %v2907_v18 = vpop.permute.xlu2 %1476  ;;  %v2910_v22 = vpop.permute.xlu0 %1262  ;;  %v609_v42 = vpack.c.b16 %v586_v34, %v585_v27  ;;  %v441_v63 = vadd.f32 %v2577_v39, %v440_v10  ;;  %v1648_v34 = vsel %vm1646_vm11, %v1615_v25, %v2858_v37 }
 0x138   : > { %v674_v43 = vshrl.u32 %v609_v42, 16  ;;  %v677_v44 = vshll.u32 %v609_v42, 16  ;;  %v492_v50 = vmax.f32 %v441_v63, 0.0 }
 0x13a   : > { %v676_v7 = vrot.slane %v674_v43, 7  ;;  %v524_v12 = vpack.c.bf16 %v492_v50, %v492_v50 }
 0x13b   : > { %1334 = vrot.lane.b32.xlu1 %v2789_v51, %s2426_s9 }
 0x13c   : > { %1364 = vrot.lane.b32.xlu2 %v2770_v11, %s2430_s16  ;;  %1492 = vrot.lane.b32.xlu0 %v1227_v33, %s2428_s14  ;;  %v679_v11 = vor.u32 %v677_v44, %v676_v7  ;;  %v2943_v3 = vsel %vm2585_vm5, %v676_v7, 0  ;;  %v1229_v7 = vrot.slane %v2842_v31, 1 }
 0x13d   : > { %v1421_v35 = vpop.permute.xlu1 %1420  ;;  %v901_v6 = vshll.u32 %v2943_v3, 16  ;;  %v443_v52 = vpop.f32.mrf.mxu0 }
 0x13e   : > { %v2922_v26 = vpop.permute.xlu2 %1446  ;;  %v2924_v21 = vpop.permute.xlu0 %1414  ;;  %v2939_v2 = vsel %vm2585_vm5, 0, %v679_v11  ;;  %v1681_v42 = vsel %vm1679_vm12, %v1648_v34, %v1421_v35  ;;  %v444_v54 = vadd.f32 %v2577_v39, %v443_v52  ;;  %v1231_v52 = vrot.slane %v2880_v24, 1 }
 0x13f   : > { %v896_v13 = vshll.u32 %v2939_v2, 16  ;;  %v894_v19 = vshrl.u32 %v2939_v2, 16  ;;  %v903_v32 = vrot.slane %v901_v6, 1 }
 0x140   : > { %v493_v10 = vmax.f32 %v444_v54, 0.0 }
 0x141   : > { %v898_v20 = vrot.slane %v896_v13, 1 }
 0x142   : > { %v525_v55 = vpack.c.bf16 %v493_v10, %v493_v10 }
 0x143   : > { %1304 = vrot.lane.b32.xlu1 %v1227_v33, %s2424_s20  ;;  %v899_v27 = vor.u32 %v898_v20, %v894_v19 }
 0x144   : > { %1460 = vrot.lane.b32.xlu2 %v2808_v46, %s2431_s17  ;;  %1398 = vrot.lane.b32.xlu0 %v1227_v33, %s2427_s13  ;;  %v587_v33 = vunpack.c.l.b16 %v523_v16 }
 0x145   : > { %v2933_v61 = vpop.permute.xlu1 %1326  ;;  %v2969_v36 = vsel %vm796_vm7, %v899_v27, %v903_v32  ;;  %v445_v20 = vpop.f32.mrf.mxu0 }
 0x146   : > { %v1453_v1 = vpop.permute.xlu2 %1452  ;;  %v2947_v8 = vpop.permute.xlu0 %1296  ;;  %2260 = vmatmul.msk.bf16.gmra.mxu1 %vm994_vm8, %v2969_v36  ;;  %v446_v50 = vadd.f32 %v2577_v39, %v445_v20 }
 0x147   : > { %v1714_v37 = vsel %vm1712_vm13, %v1681_v42, %v1453_v1  ;;  %v1230_v1 = vsel %vm1207_vm6, %v1228_v40, %v1229_v7 }
 0x148   : > { %v494_v32 = vmax.f32 %v446_v50, 0.0 }
 0x14b   : > { %1430 = vrot.lane.b32.xlu1 %v2833_v5, %s2429_s15 }
 0x14c   : > { %1366 = vrot.lane.b32.xlu2 %v2808_v46, %s2430_s16  ;;  %1272 = vrot.lane.b32.xlu0 %v2808_v46, %s2425_s21  ;;  %v588_v46 = vunpack.c.l.b16 %v524_v12 }
 0x14d   : > { %v1353_v38 = vpop.permute.xlu1 %1352 }
 0x14e   : > { %v2973_v43 = vsel %vm1580_vm9, %v1577_v57, %v1353_v38  ;;  %v2975_v44 = vpop.permute.xlu2 %1358  ;;  %v1485_v45 = vpop.permute.xlu0 %1484  ;;  %v610_v11 = vpack.c.b16 %v588_v46, %v587_v33  ;;  %v589_v38 = vunpack.c.l.b16 %v525_v55  ;;  %v526_v57 = vpack.c.bf16 %v494_v32, %v494_v32 }
 0x14f   : > { %v1747_v35 = vsel %vm1745_vm14, %v1714_v37, %v1485_v45 }
 0x150   : > { %2276 = vmatmul.msk.bf16.vlgmr.msra.gmra.mxu2 %vm1802_vm15, %v1747_v35  ;;  %v681_v0 = vshrl.u32 %v610_v11, 16  ;;  %v684_v4 = vshll.u32 %v610_v11, 16  ;;  %v590_v40 = vunpack.c.l.b16 %v526_v57  ;;  %v1232_v35 = vrot.slane %v2891_v60, 1  ;;  %v448_v11 = vpop.f32.mrf.mxu0 }
 0x152   : > { %v683_v31 = vrot.slane %v681_v0, 7  ;;  %v611_v0 = vpack.c.b16 %v590_v40, %v589_v38  ;;  %v1233_v10 = vsel %vm1207_vm6, %v1231_v52, %v1232_v35 }
 0x153   : > { %1336 = vrot.lane.b32.xlu1 %v2833_v5, %s2426_s9 }
 0x154   : > { %1306 = vrot.lane.b32.xlu2 %v1230_v1, %s2424_s20  ;;  %1494 = vrot.lane.b32.xlu0 %v1230_v1, %s2428_s14  ;;  %v686_v63 = vor.u32 %v684_v4, %v683_v31  ;;  %v3002_v25 = vsel %vm2585_vm5, %v683_v31, 0  ;;  %v449_v4 = vadd.f32 %v2577_v39, %v448_v11  ;;  %v691_v31 = vshll.u32 %v611_v0, 16 }
 0x155   : > { %v2990_v13 = vpop.permute.xlu1 %1264  ;;  %v913_v34 = vshll.u32 %v3002_v25, 16 }
 0x156   : > { %v2992_v16 = vpop.permute.xlu2 %1454  ;;  %v2994_v19 = vpop.permute.xlu0 %1390  ;;  %v2998_v6 = vsel %vm2585_vm5, 0, %v686_v63  ;;  %v495_v63 = vmax.f32 %v449_v4, 0.0 }
 0x157   : > { %v908_v27 = vshll.u32 %v2998_v6, 16  ;;  %v906_v33 = vshrl.u32 %v2998_v6, 16  ;;  %v915_v37 = vrot.slane %v913_v34, 1 }
 0x158   : > { %v450_v32 = vpop.f32.mrf.mxu0 }
 0x159   : > { %v910_v12 = vrot.slane %v908_v27, 1  ;;  %v527_v27 = vpack.c.bf16 %v495_v63, %v495_v63 }
 0x15b   : > { %1274 = vrot.lane.b32.xlu1 %v2863_v41, %s2425_s21  ;;  %v911_v46 = vor.u32 %v910_v12, %v906_v33  ;;  %v2358_v12 = vld [vmem:[%s3712_s2] ss:$0 sm:$0xff]  ;;  %v591_v40 = vunpack.c.l.b16 %v527_v27 }
 0x15c   : > { %1462 = vrot.lane.b32.xlu2 %v2863_v41, %s2431_s17  ;;  %1400 = vrot.lane.b32.xlu0 %v1230_v1, %s2427_s13  ;;  %v688_v1 = vshrl.u32 %v611_v0, 16 }
 0x15d   : > { %v3013_v42 = vpop.permute.xlu1 %1478  ;;  %v3022_v54 = vsel %vm796_vm7, %v911_v46, %v915_v37  ;;  %v468_v46 = vpop.f32.mrf.mxu3  ;;  %v1519_v37 = vsel %vm994_vm8, %v2598_v15, %v2910_v22 }
 0x15e   : > { %v3015_v45 = vpop.permute.xlu2 %1360  ;;  %v3017_v7 = vpop.permute.xlu0 %1510  ;;  %2261 = vmatmul.msk.bf16.gmra.mxu1 %vm994_vm8, %v3022_v54  ;;  %v690_v60 = vrot.slane %v688_v1, 7  ;;  %v1551_v63 = vsel %vm331_vm1, %v1519_v37, %v2810_v47 }
 0x160   : > { %v693_v39 = vor.u32 %v691_v31, %v690_v60  ;;  %v3046_v34 = vsel %vm2585_vm5, %v690_v60, 0 }
 0x161   : > { %v925_v0 = vshll.u32 %v3046_v34, 16 }
 0x162   : > { %v3039_v33 = vsel %vm2585_vm5, 0, %v693_v39  ;;  %v453_v39 = vpop.f32.mrf.mxu0 }
 0x163   : > { %1432 = vrot.lane.b32.xlu1 %v2880_v24, %s2429_s15  ;;  %v920_v57 = vshll.u32 %v3039_v33, 16  ;;  %v918_v35 = vshrl.u32 %v3039_v33, 16  ;;  %v927_v31 = vrot.slane %v925_v0, 1 }
 0x164   : > { %1368 = vrot.lane.b32.xlu2 %v2863_v41, %s2430_s16  ;;  %1308 = vrot.lane.b32.xlu0 %v1233_v10, %s2424_s20  ;;  %v451_v41 = vadd.f32 %v2358_v12, %v450_v32 }
 0x165   : > { %v1423_v20 = vpop.permute.xlu1 %1422  ;;  %v922_v11 = vrot.slane %v920_v57, 1  ;;  %v1584_v57 = vsel %vm1580_vm9, %v1551_v63, %v2933_v61 }
 0x166   : > { %v3033_v55 = vpop.permute.xlu2 %1300  ;;  %v3035_v50 = vpop.permute.xlu0 %1290  ;;  %v496_v38 = vmax.f32 %v451_v41, 0.0  ;;  %v454_v41 = vadd.f32 %v2358_v12, %v453_v39  ;;  %v1617_v47 = vsel %vm1613_vm10, %v1584_v57, %v2975_v44  ;;  %v469_v44 = vadd.f32 %v2358_v12, %v468_v46 }
 0x167   : > { %v923_v22 = vor.u32 %v922_v11, %v918_v35  ;;  %v470_v11 = vpop.f32.mrf.mxu3 }
 0x168   : > { %v528_v52 = vpack.c.bf16 %v496_v38, %v496_v38 }
 0x169   : > { %v3070_v38 = vsel %vm796_vm7, %v923_v22, %v927_v31 }
 0x16a   : > { %v592_v15 = vunpack.c.l.b16 %v528_v52 }
 0x16b   : > { %1338 = vrot.lane.b32.xlu1 %v2880_v24, %s2426_s9 }
 0x16c   : > { %1276 = vrot.lane.b32.xlu2 %v2905_v17, %s2425_s21  ;;  %1496 = vrot.lane.b32.xlu0 %v1233_v10, %s2428_s14  ;;  %v612_v32 = vpack.c.b16 %v592_v15, %v591_v40  ;;  %v497_v40 = vmax.f32 %v454_v41, 0.0  ;;  %v471_v15 = vadd.f32 %v2358_v12, %v470_v11  ;;  %v1521_v11 = vsel %vm994_vm8, %v2640_v9, %v2990_v13 }
 0x16d   : > { %v3059_v4 = vpop.permute.xlu1 %1328 }
 0x16e   : > { %v3061_v1 = vpop.permute.xlu2 %1268  ;;  %v1385_v60 = vpop.permute.xlu0 %1384  ;;  %2262 = vmatmul.msk.bf16.gmra.mxu1 %vm994_vm8, %v3070_v38  ;;  %v695_v37 = vshrl.u32 %v612_v32, 16  ;;  %v698_v52 = vshll.u32 %v612_v32, 16  ;;  %v529_v39 = vpack.c.bf16 %v497_v40, %v497_v40 }
 0x16f   : > { %v3067_v27 = vsel %vm1613_vm10, %v2973_v43, %v1385_v60  ;;  %v1650_v43 = vsel %vm1646_vm11, %v1617_v47, %v2994_v19  ;;  %v1234_v60 = vrot.slane %v2939_v2, 1  ;;  %v455_v32 = vpop.f32.mrf.mxu0  ;;  %v1525_v62 = vsel %vm994_vm8, %v2720_v23, %v3061_v1 }
 0x170   : > { %v1683_v35 = vsel %vm1679_vm12, %v1650_v43, %v1423_v20  ;;  %v697_v61 = vrot.slane %v695_v37, 7  ;;  %v1235_v20 = vrot.slane %v2943_v3, 1  ;;  %v456_v46 = vadd.f32 %v2358_v12, %v455_v32 }
 0x171   : > { %v1716_v63 = vsel %vm1712_vm13, %v1683_v35, %v2992_v16  ;;  %v503_v37 = vmax.f32 %v469_v44, 0.0  ;;  %v504_v3 = vmax.f32 %v471_v15, 0.0  ;;  %v593_v43 = vunpack.c.l.b16 %v529_v39 }
 0x172   : > { %v700_v31 = vor.u32 %v698_v52, %v697_v61  ;;  %v3100_v57 = vsel %vm2585_vm5, %v697_v61, 0  ;;  %v498_v16 = vmax.f32 %v456_v46, 0.0  ;;  %v1236_v52 = vsel %vm1207_vm6, %v1234_v60, %v1235_v20 }
 0x173   : > { %1434 = vrot.lane.b32.xlu1 %v2939_v2, %s2429_s15  ;;  %v937_v61 = vshll.u32 %v3100_v57, 16  ;;  %v535_v60 = vpack.c.bf16 %v503_v37, %v503_v37  ;;  %v536_v20 = vpack.c.bf16 %v504_v3, %v504_v3  ;;  %v1553_v39 = vsel %vm331_vm1, %v1521_v11, %v2947_v8  ;;  %v3138_v11 = vpop.f32.mrf.mxu1 }
 0x174   : > { %1464 = vrot.lane.b32.xlu2 %v2905_v17, %s2431_s17  ;;  %1402 = vrot.lane.b32.xlu0 %v1233_v10, %s2427_s13  ;;  %v3095_v41 = vsel %vm2585_vm5, 0, %v700_v31  ;;  %v530_v12 = vpack.c.bf16 %v498_v16, %v498_v16  ;;  %v1586_v46 = vsel %vm1580_vm9, %v1553_v39, %v3059_v4 }
 0x175   : > { %v3086_v0 = vpop.permute.xlu1 %1298  ;;  %v932_v47 = vshll.u32 %v3095_v41, 16  ;;  %v930_v40 = vshrl.u32 %v3095_v41, 16  ;;  %v599_v16 = vunpack.c.l.b16 %v535_v60  ;;  %v1619_v8 = vsel %vm1613_vm10, %v1586_v46, %v3015_v45 }
 0x176   : > { %v1457_v22 = vpop.permute.xlu2 %1456  ;;  %v1487_v19 = vpop.permute.xlu0 %1486  ;;  %v594_v31 = vunpack.c.l.b16 %v530_v12 }
 0x177   : > { %v1749_v10 = vsel %vm1745_vm14, %v1716_v63, %v1487_v19  ;;  %v934_v35 = vrot.slane %v932_v47, 1  ;;  %v939_v63 = vrot.slane %v937_v61, 1  ;;  %v600_v47 = vunpack.c.l.b16 %v536_v20 }
 0x178   : > { %2277 = vmatmul.msk.bf16.gmra.mxu2 %vm1802_vm15, %v1749_v10  ;;  %v613_v32 = vpack.c.b16 %v594_v31, %v593_v43 }
 0x179   : > { %v935_v19 = vor.u32 %v934_v35, %v930_v40  ;;  %v1237_v40 = vrot.slane %v2998_v6, 1  ;;  %v1238_v35 = vrot.slane %v3002_v25, 1 }
 0x17a   : > { %v702_v9 = vshrl.u32 %v613_v32, 16  ;;  %v705_v13 = vshll.u32 %v613_v32, 16 }
 0x17b   : > { %1372 = vrot.lane.b32.xlu1 %v2969_v36, %s2430_s16  ;;  %v3119_v10 = vsel %vm796_vm7, %v935_v19, %v939_v63  ;;  %v616_v19 = vpack.c.b16 %v600_v47, %v599_v16  ;;  %v1239_v25 = vsel %vm1207_vm6, %v1237_v40, %v1238_v35 }
 0x17c   : > { %1370 = vrot.lane.b32.xlu2 %v2905_v17, %s2430_s16  ;;  %1498 = vrot.lane.b32.xlu0 %v1236_v52, %s2428_s14  ;;  %v704_v37 = vrot.slane %v702_v9, 7 }
 0x17d   : > { %v1267_v44 = vpop.permute.xlu1 %1266 }
 0x17e   : > { %v3114_v15 = vpop.permute.xlu2 %1362  ;;  %v1393_v17 = vpop.permute.xlu0 %1392  ;;  %2263 = vmatmul.msk.bf16.gmra.mxu1 %vm994_vm8, %v3119_v10  ;;  %v707_v61 = vor.u32 %v705_v13, %v704_v37 }
 0x17f   : > { %v1652_v4 = vsel %vm1646_vm11, %v1619_v8, %v1393_v17  ;;  %v3149_v17 = vsel %vm2585_vm5, %v704_v37, 0 }
 0x180   : > { %v3144_v60 = vsel %vm2585_vm5, 0, %v707_v61  ;;  %v949_v46 = vshll.u32 %v3149_v17, 16 }
 0x181   : > { %v944_v20 = vshll.u32 %v3144_v60, 16  ;;  %v942_v39 = vshrl.u32 %v3144_v60, 16 }
 0x182   : > { %v951_v47 = vrot.slane %v949_v46, 1 }
 0x183   : > { %1342 = vrot.lane.b32.xlu1 %v2998_v6, %s2426_s9  ;;  %v946_v32 = vrot.slane %v944_v20, 1 }
 0x184   : > { %1340 = vrot.lane.b32.xlu2 %v2939_v2, %s2426_s9  ;;  %1404 = vrot.lane.b32.xlu0 %v1236_v52, %s2427_s13 }
 0x185   : > { %v1425_v3 = vpop.permute.xlu1 %1424  ;;  %v947_v16 = vor.u32 %v946_v32, %v942_v39 }
 0x186   : > { %v1685_v43 = vsel %vm1679_vm12, %v1652_v4, %v1425_v3  ;;  %v3134_v12 = vpop.permute.xlu2 %1270  ;;  %v1489_v45 = vpop.permute.xlu0 %1488  ;;  %v726_v4 = vshll.u32 %v616_v19, 16 }
 0x187   : > { %v1718_v31 = vsel %vm1712_vm13, %v1685_v43, %v1457_v22  ;;  %v723_v22 = vshrl.u32 %v616_v19, 16  ;;  %v3160_v3 = vsel %vm796_vm7, %v947_v16, %v951_v47  ;;  %v3162_v43 = vpop.f32.mrf.mxu1 }
 0x188   : > { %v1751_v63 = vsel %vm1745_vm14, %v1718_v31, %v1489_v45 }
 0x189   : > { %2278 = vmatmul.msk.bf16.gmra.mxu2 %vm1802_vm15, %v1751_v63  ;;  %v725_v37 = vrot.slane %v723_v22, 7 }
 0x18b   : > { %1312 = vrot.lane.b32.xlu1 %v1239_v25, %s2424_s20  ;;  %v728_v40 = vor.u32 %v726_v4, %v725_v37  ;;  %v3195_v20 = vsel %vm2585_vm5, %v725_v37, 0 }
 0x18c   : > { %1310 = vrot.lane.b32.xlu2 %v1236_v52, %s2424_s20  ;;  %1278 = vrot.lane.b32.xlu0 %v2969_v36, %s2425_s21  ;;  %v1523_v52 = vsel %vm994_vm8, %v2687_v56, %v1267_v44  ;;  %v985_v32 = vshll.u32 %v3195_v20, 16 }
 0x18d   : > { %v1331_v9 = vpop.permute.xlu1 %1330  ;;  %v1555_v35 = vsel %vm331_vm1, %v1523_v52, %v3086_v0  ;;  %v3180_v44 = vsel %vm2585_vm5, 0, %v728_v40  ;;  %v1240_v52 = vrot.slane %v3039_v33, 1  ;;  %v1241_v40 = vrot.slane %v3046_v34, 1 }
 0x18e   : > { %v1459_v13 = vpop.permute.xlu2 %1458  ;;  %v1395_v8 = vpop.permute.xlu0 %1394  ;;  %2264 = vmatmul.msk.bf16.gmra.mxu1 %vm994_vm8, %v3160_v3  ;;  %v1588_v61 = vsel %vm1580_vm9, %v1555_v35, %v1331_v9  ;;  %v978_v22 = vshrl.u32 %v3180_v44, 16 }
 0x18f   : > { %v1621_v19 = vsel %vm1613_vm10, %v1588_v61, %v3114_v15 }
 0x190   : > { %v1654_v0 = vsel %vm1646_vm11, %v1621_v19, %v1395_v8  ;;  %v987_v8 = vrot.slane %v985_v32, 1  ;;  %v1246_v32 = vrot.slane %v3144_v60, 1 }
 0x193   : > { %1280 = vrot.lane.b32.xlu1 %v3022_v54, %s2425_s21 }
 0x194   : > { %1466 = vrot.lane.b32.xlu2 %v2969_v36, %s2431_s17  ;;  %1500 = vrot.lane.b32.xlu0 %v1239_v25, %s2428_s14  ;;  %v980_v36 = vshll.u32 %v3180_v44, 16 }
 0x195   : > { %v1427_v45 = vpop.permute.xlu1 %1426 }
 0x196   : > { %v1365_v31 = vpop.permute.xlu2 %1364  ;;  %v3176_v56 = vpop.permute.xlu0 %1302  ;;  %v1687_v63 = vsel %vm1679_vm12, %v1654_v0, %v1427_v45  ;;  %v982_v39 = vrot.slane %v980_v36, 1  ;;  %v1244_v0 = vrot.slane %v3100_v57, 1 }
 0x197   : > { %v1720_v16 = vsel %vm1712_vm13, %v1687_v63, %v1459_v13  ;;  %v1557_v13 = vsel %vm331_vm1, %v1525_v62, %v3033_v55  ;;  %v3223_v55 = vsel %vm1207_vm6, %v1240_v52, %v1241_v40 }
 0x198   : > { %v983_v47 = vor.u32 %v982_v39, %v978_v22 }
 0x19b   : > { %1468 = vrot.lane.b32.xlu1 %v3022_v54, %s2431_s17 }
 0x19c   : > { %1436 = vrot.lane.b32.xlu2 %v2998_v6, %s2429_s15  ;;  %1374 = vrot.lane.b32.xlu0 %v3022_v54, %s2430_s16  ;;  %v3206_v54 = vsel %vm796_vm7, %v983_v47, %v987_v8  ;;  %v1527_v47 = vsel %vm994_vm8, %v2756_v59, %v3134_v12 }
 0x19d   : > { %v1333_v15 = vpop.permute.xlu1 %1332  ;;  %2267 = vmatmul.msk.bf16.gmra.mxu3 %vm994_vm8, %v3206_v54 }
 0x19e   : > { %v1461_v46 = vpop.permute.xlu2 %1460  ;;  %v1491_v9 = vpop.permute.xlu0 %1490  ;;  %v1590_v23 = vsel %vm1580_vm9, %v1557_v13, %v1333_v15 }
 0x19f   : > { %v1753_v4 = vsel %vm1745_vm14, %v1720_v16, %v1491_v9  ;;  %v1623_v61 = vsel %vm1613_vm10, %v1590_v23, %v1365_v31  ;;  %v1243_v31 = vrot.slane %v3095_v41, 1 }
 0x1a0   : > { %2279 = vmatmul.msk.bf16.gmra.mxu2 %vm1802_vm15, %v1753_v4 }
 0x1a1   : > { %v3240_v22 = vsel %vm1207_vm6, %v1243_v31, %v1244_v0 }
 0x1a3   : > { %1438 = vrot.lane.b32.xlu1 %v3039_v33, %s2429_s15 }
 0x1a4   : > { %1406 = vrot.lane.b32.xlu2 %v1239_v25, %s2427_s13  ;;  %1344 = vrot.lane.b32.xlu0 %v3039_v33, %s2426_s9 }
 0x1a5   : > { %v1429_v1 = vpop.permute.xlu1 %1428 }
 0x1a6   : > { %v1367_v37 = vpop.permute.xlu2 %1366  ;;  %v1397_v35 = vpop.permute.xlu0 %1396 }
 0x1a7   : > { %v1656_v45 = vsel %vm1646_vm11, %v1623_v61, %v1397_v35 }
 0x1a8   : > { %v1689_v25 = vsel %vm1679_vm12, %v1656_v45, %v1429_v1 }
 0x1a9   : > { %v1722_v63 = vsel %vm1712_vm13, %v1689_v25, %v1461_v46  ;;  %v1247_v46 = vrot.slane %v3149_v17, 1  ;;  %v1559_v17 = vsel %vm331_vm1, %v1527_v47, %v3176_v56 }
 0x1ab   : > { %1408 = vrot.lane.b32.xlu1 %v3223_v55, %s2427_s13  ;;  %v3251_v16 = vsel %vm1207_vm6, %v1246_v32, %v1247_v46 }
 0x1ac   : > { %1502 = vrot.lane.b32.xlu2 %v3223_v55, %s2428_s14  ;;  %1470 = vrot.lane.b32.xlu0 %v3070_v38, %s2431_s17 }
 0x1ad   : > { %v1335_v34 = vpop.permute.xlu1 %1334 }
 0x1ae   : > { %v3232_v19 = vpop.permute.xlu2 %1306  ;;  %v1493_v36 = vpop.permute.xlu0 %1492  ;;  %v1592_v62 = vsel %vm1580_vm9, %v1559_v17, %v1335_v34 }
 0x1af   : > { %v1755_v15 = vsel %vm1745_vm14, %v1722_v63, %v1493_v36  ;;  %v1625_v23 = vsel %vm1613_vm10, %v1592_v62, %v1367_v37  ;;  %v1257_v63 = vrot.slane %v3180_v44, 1 }
 0x1b0   : > { %2280 = vmatmul.msk.bf16.gmra.mxu2 %vm1802_vm15, %v1755_v15 }
 0x1b3   : > { %1316 = vrot.lane.b32.xlu1 %v3240_v22, %s2424_s20 }
 0x1b4   : > { %1282 = vrot.lane.b32.xlu2 %v3070_v38, %s2425_s21  ;;  %1284 = vrot.lane.b32.xlu0 %v3119_v10, %s2425_s21 }
 0x1b5   : > { %v1305_v57 = vpop.permute.xlu1 %1304 }
 0x1b6   : > { %v1463_v39 = vpop.permute.xlu2 %1462  ;;  %v1399_v9 = vpop.permute.xlu0 %1398 }
 0x1b7   : > { %v1658_v1 = vsel %vm1646_vm11, %v1625_v23, %v1399_v9 }
 0x1bb   : > { %1412 = vrot.lane.b32.xlu1 %v3251_v16, %s2427_s13 }
 0x1bc   : > { %1376 = vrot.lane.b32.xlu2 %v3070_v38, %s2430_s16  ;;  %1348 = vrot.lane.b32.xlu0 %v3144_v60, %s2426_s9 }
 0x1bd   : > { %v1431_v8 = vpop.permute.xlu1 %1430 }
 0x1be   : > { %v1369_v4 = vpop.permute.xlu2 %1368  ;;  %v1273_v13 = vpop.permute.xlu0 %1272  ;;  %v1691_v38 = vsel %vm1679_vm12, %v1658_v1, %v1431_v8 }
 0x1bf   : > { %v1724_v52 = vsel %vm1712_vm13, %v1691_v38, %v1463_v39  ;;  %v1529_v45 = vsel %vm994_vm8, %v2789_v51, %v1273_v13  ;;  %v1258_v51 = vrot.slane %v3195_v20, 1 }
 0x1c0   : > { %v1561_v34 = vsel %vm331_vm1, %v1529_v45, %v1305_v57 }
 0x1c1   : > { %v1259_v32 = vsel %vm1207_vm6, %v1257_v63, %v1258_v51 }
 0x1c3   : > { %1286 = vrot.lane.b32.xlu1 %v3160_v3, %s2425_s21  ;;  %s2373_s21 = sshra.s32 %s2167_s18, 4  ;;  %s2374_s21 = int_to_ptr.hbm [resolvable:$true] %s2373_s21 }
 0x1c4   : > { %1380 = vrot.lane.b32.xlu2 %v3160_v3, %s2430_s16  ;;  %1318 = vrot.lane.b32.xlu0 %v3251_v16, %s2424_s20  ;;  %p2380_p0 = scmp.lt.s32.totalorder %s2374_s21, %s3717_s7 }
 0x1c5   : > { %v1337_v59 = vpop.permute.xlu1 %1336 }
 0x1c6   : > { %v3274_v12 = vpop.permute.xlu2 %1276  ;;  %v1495_v56 = vpop.permute.xlu0 %1494  ;;  %v1594_v0 = vsel %vm1580_vm9, %v1561_v34, %v1337_v59 }
 0x1c7   : > { %v1757_v37 = vsel %vm1745_vm14, %v1724_v52, %v1495_v56  ;;  %v1627_v15 = vsel %vm1613_vm10, %v1594_v0, %v1369_v4 }
 0x1c8   : > { %2281 = vmatmul.msk.bf16.gmra.mxu2 %vm1802_vm15, %v1757_v37 }
 0x1cb   : > { %1448 = vrot.lane.b32.xlu1 %v3180_v44, %s2429_s15 }
 0x1cc   : > { %1416 = vrot.lane.b32.xlu2 %v2741_v48, %s2427_s13  ;;  %1440 = vrot.lane.b32.xlu0 %v3095_v41, %s2429_s15 }
 0x1cd   : > { %v1275_v40 = vpop.permute.xlu1 %1274 }
 0x1ce   : > { %v1465_v35 = vpop.permute.xlu2 %1464  ;;  %v1401_v61 = vpop.permute.xlu0 %1400 }
 0x1cf   : > { %v1660_v39 = vsel %vm1646_vm11, %v1627_v15, %v1401_v61 }
 0x1d3   : > { %1504 = vrot.lane.b32.xlu1 %v3240_v22, %s2428_s14  ;;  %v1847_v23 = vpop.f32.mrf.mxu2 }
 0x1d4   : > { %1472 = vrot.lane.b32.xlu2 %v3119_v10, %s2431_s17  ;;  %1480 = vrot.lane.b32.xlu0 %v3206_v54, %s2431_s17 }
 0x1d5   : > { %v1433_v25 = vpop.permute.xlu1 %1432 }
 0x1d6   : > { %v1371_v31 = vpop.permute.xlu2 %1370  ;;  %v3295_v36 = vpop.permute.xlu0 %1308  ;;  %v1693_v57 = vsel %vm1679_vm12, %v1660_v39, %v1433_v25 }
 0x1d7   : > { %v1726_v20 = vsel %vm1712_vm13, %v1693_v57, %v1465_v35 }
 0x1db   : > { %1322 = vrot.lane.b32.xlu1 %v2741_v48, %s2424_s20  ;;  %v1531_v48 = vsel %vm994_vm8, %v2833_v5, %v1275_v40  ;;  %v1849_v52 = vpop.f32.mrf.mxu2  ;;  %v3344_v40 = vld [vmem:[%s3716_s6] ss:$0 sm:$0xff] }
 0x1dc   : > { %1512 = vrot.lane.b32.xlu2 %v1259_v32, %s2428_s14  ;;  %1314 = vrot.lane.b32.xlu0 %v3223_v55, %s2424_s20  ;;  %v1563_v17 = vsel %vm331_vm1, %v1531_v48, %v3232_v19  ;;  %v1848_v61 = vadd.f32 %v3344_v40, %v1847_v23  ;;  %v1850_v45 = vadd.f32 %v3344_v40, %v1849_v52 }
 0x1dd   : > { %v1339_v46 = vpop.permute.xlu1 %1338 }
 0x1de   : > { %v1341_v9 = vpop.permute.xlu2 %1340  ;;  %v1497_v47 = vpop.permute.xlu0 %1496  ;;  %v1596_v62 = vsel %vm1580_vm9, %v1563_v17, %v1339_v46  ;;  %v1927_v0 = vmax.f32 %v1848_v61, 0.0  ;;  %v1928_v63 = vmax.f32 %v1850_v45, 0.0 }
 0x1df   : > { %v1759_v8 = vsel %vm1745_vm14, %v1726_v20, %v1497_v47  ;;  %v1629_v5 = vsel %vm1613_vm10, %v1596_v62, %v1371_v31 }
 0x1e0   : > { %2282 = vmatmul.msk.bf16.gmra.mxu2 %vm1802_vm15, %v1759_v8 }
 0x1e3   : > { %1378 = vrot.lane.b32.xlu1 %v3119_v10, %s2430_s16 }
 0x1e4   : > { %1346 = vrot.lane.b32.xlu2 %v3095_v41, %s2426_s9  ;;  %1354 = vrot.lane.b32.xlu0 %v3180_v44, %s2426_s9  ;;  %s2375_s9 = scalar_lea.hbm %s2374_s21, 256 }
 0x1e5   : > { %v1435_v55 = vpop.permute.xlu1 %1434  ;;  %p2376_p11 = scmp.ne.s32.totalorder %s2374_s21, %s2375_s9 }
 0x1e6   : > { %v3321_v4 = vpop.permute.xlu2 %1310  ;;  %v1403_v13 = vpop.permute.xlu0 %1402 }
 0x1e7   : > { %v1662_v10 = vsel %vm1646_vm11, %v1629_v5, %v1403_v13  ;;  %p2377_p12 = pnand %p2376_p11, %p2511_p5 }
 0x1e8   : > { %v1695_v1 = vsel %vm1679_vm12, %v1662_v10, %v1435_v55 }
 0x1e9   : > { %p2378_p13 = pneg %p2377_p12 }
 0x1eb   : > { %1418 = vrot.lane.b32.xlu1 %v1259_v32, %s2427_s13 }
 0x1ec   : > { %1386 = vrot.lane.b32.xlu2 %v3206_v54, %s2430_s16  ;;  %1410 = vrot.lane.b32.xlu0 %v3240_v22, %s2427_s13 }
 0x1ed   : > { %v1373_v44 = vpop.permute.xlu1 %1372 }
 0x1ee   : > { %v1467_v19 = vpop.permute.xlu2 %1466  ;;  %v1499_v59 = vpop.permute.xlu0 %1498 }
 0x1ef   : > { %v1728_v38 = vsel %vm1712_vm13, %v1695_v1, %v1467_v19 }
 0x1f0   : > { %v1761_v56 = vsel %vm1745_vm14, %v1728_v38, %v1499_v59 }
 0x1f1   : > { %2283 = vmatmul.msk.bf16.gmra.mxu2 %vm1802_vm15, %v1761_v56 }
 0x1f3   : > { %1474 = vrot.lane.b32.xlu1 %v3160_v3, %s2431_s17 }
 0x1f4   : > { %1442 = vrot.lane.b32.xlu2 %v3144_v60, %s2429_s15  ;;  %1450 = vrot.lane.b32.xlu0 %v2423_v29, %s2429_s15  ;;  %s269_s15 = sand.u32 1, %s2413_s25  }
 0x1f5   : > { %v1343_v54 = vpop.permute.xlu1 %1342  ;;  %s2233_s16 = sshll.u32 %s269_s15, 8  ;;  %s2152_s19 = scalar_lea.sflag [#allocation3], %s269_s15 }
 0x1f6   : > { %v1437_v22 = vpop.permute.xlu2 %1436  ;;  %v1405_v37 = vpop.permute.xlu0 %1404 }
 0x1fb   : > { %1514 = vrot.lane.b32.xlu1 %v2559_v30, %s2428_s14  ;;  %v1852_v35 = vpop.f32.mrf.mxu2 }
 0x1fc   : > { %1482 = vrot.lane.b32.xlu2 %v2559_v30, %s2431_s17  ;;  %1506 = vrot.lane.b32.xlu0 %v3251_v16, %s2428_s14  ;;  %v1853_v29 = vadd.f32 %v3344_v40, %v1852_v35  ;;  %v1533_v16 = vsel %vm994_vm8, %v2880_v24, %v3274_v12  ;;  %s3465_s17 = scalar_lea.vmem [#allocation2], %s2233_s16  ;;  %s2379_s16 = scalar_lea.hbm %s3717_s7, 512 }
 0x1fd   : > { %v3353_v3 = vpop.permute.xlu1 %1312  ;;  %v1565_v32 = vsel %vm331_vm1, %v1533_v16, %v3295_v36  ;;  %s2164_s8 = sshll.u32 %s3465_s17, 4  ;;  %p2381_p1 = scmp.lt.s32.totalorder %s2379_s16, %s2375_s9  ;;  %s2165_s8 = int_to_ptr.vmem [resolvable:$true] %s2164_s8 }
 0x1fe   : > { %v1407_v25 = vpop.permute.xlu2 %1406  ;;  %v1279_v34 = vpop.permute.xlu0 %1278  ;;  %v1929_v31 = vmax.f32 %v1853_v29, 0.0  ;;  %v1598_v46 = vsel %vm1580_vm9, %v1565_v32, %v1341_v9 }
 0x1ff   : > { %v1631_v47 = vsel %vm1613_vm10, %v1598_v46, %v1373_v44  ;;  %v1535_v23 = vsel %vm994_vm8, %v2939_v2, %v1279_v34  ;;  %p2382_p2 = por %p2381_p1, %p2380_p0 }
 0x200   : > { %v1664_v20 = vsel %vm1646_vm11, %v1631_v47, %v1405_v37  ;;  %v1567_v1 = vsel %vm331_vm1, %v1535_v23, %v3321_v4 }
 0x201   : > { %v1697_v12 = vsel %vm1679_vm12, %v1664_v20, %v1437_v22  ;;  %v1600_v56 = vsel %vm1580_vm9, %v1567_v1, %v1343_v54  ;;  %p2383_p3 = pnand %p2382_p2, %p2378_p13 }
 0x203   : > { %1995 = vrot.lane.b32.xlu1 %v1929_v31, %s2424_s20  ;;  %v1854_v51 = vpop.f32.mrf.mxu2 }
 0x204   : > { %1993 = vrot.lane.b32.xlu0 %v1928_v63, %s2424_s20  ;;  %1991 = vrot.lane.b32.xlu2 %v1927_v0, %s2424_s20  ;;  %v1855_v15 = vadd.f32 %v3344_v40, %v1854_v51 }
 0x205   : > { %v3360_v30 = vpop.permute.xlu1 %1280 }
 0x206   : > { %v1503_v39 = vpop.permute.xlu2 %1502  ;;  %v1501_v57 = vpop.permute.xlu0 %1500  ;;  %v1930_v8 = vmax.f32 %v1855_v15, 0.0 }
 0x20c   : > { %v1857_v48 = vpop.f32.mrf.mxu2  ;;  %1997 = vrot.lane.b32.xlu2 %v1930_v8, %s2424_s20 }
 0x20d   : > { %v1858_v55 = vadd.f32 %v3344_v40, %v1857_v48  ;;  %v1469_v24 = vpop.permute.xlu1 %1468 }
 0x20e   : > { %v1730_v17 = vsel %vm1712_vm13, %v1697_v12, %v1469_v24  ;;  %v3375_v62 = vpop.permute.xlu2 %1282  ;;  %v1375_v13 = vpop.permute.xlu0 %1374 }
 0x20f   : > { %v1931_v36 = vmax.f32 %v1858_v55, 0.0  ;;  %v1763_v9 = vsel %vm1745_vm14, %v1730_v17, %v1501_v57  ;;  %v1633_v52 = vsel %vm1613_vm10, %v1600_v56, %v1375_v13 }
 0x210   : > { %2284 = vmatmul.msk.bf16.gmra.mxu2 %vm1802_vm15, %v1763_v9  ;;  %v1666_v37 = vsel %vm1646_vm11, %v1633_v52, %v1407_v25 }
 0x211   : > { %1999 = vrot.lane.b32.xlu0 %v1931_v36, %s2424_s20 }
 0x214   : > { %v1859_v5 = vpop.f32.mrf.mxu2 }
 0x215   : > { %v1860_v10 = vadd.f32 %v3344_v40, %v1859_v5  ;;  %v1439_v44 = vpop.permute.xlu1 %1438 }
 0x216   : > { %v1377_v19 = vpop.permute.xlu2 %1376  ;;  %v1345_v59 = vpop.permute.xlu0 %1344  ;;  %v1699_v35 = vsel %vm1679_vm12, %v1666_v37, %v1439_v44 }
 0x217   : > { %v1932_v38 = vmax.f32 %v1860_v10, 0.0 }
 0x219   : > { %2001 = vrot.lane.b32.xlu1 %v1932_v38, %s2424_s20 }
 0x21d   : > { %v1409_v22 = vpop.permute.xlu1 %1408 }
 0x21e   : > { %v1381_v2 = vpop.permute.xlu2 %1380  ;;  %v1471_v29 = vpop.permute.xlu0 %1470 }
 0x21f   : > { %v1732_v61 = vsel %vm1712_vm13, %v1699_v35, %v1471_v29 }
 0x220   : > { %v1765_v45 = vsel %vm1745_vm14, %v1732_v61, %v1503_v39 }
 0x221   : > { %2285 = vmatmul.msk.bf16.gmra.mxu2 %vm1802_vm15, %v1765_v45 }
 0x223   : > { %v1862_v4 = vpop.f32.mrf.mxu2 }
 0x224   : > { %v1863_v34 = vadd.f32 %v3344_v40, %v1862_v4 }
 0x225   : > { %v1317_v31 = vpop.permute.xlu1 %1316 }
 0x226   : > { %v1417_v54 = vpop.permute.xlu2 %1416  ;;  %v1933_v0 = vmax.f32 %v1863_v34, 0.0  ;;  %v1285_v63 = vpop.permute.xlu0 %1284 }
 0x227   : > { %v1541_v25 = vsel %vm994_vm8, %v3095_v41, %v1285_v63 }
 0x228   : > { %2003 = vrot.lane.b32.xlu2 %v1933_v0, %s2424_s20  ;;  %v1573_v57 = vsel %vm331_vm1, %v1541_v25, %v1317_v31  ;;  %v1061_v31 = vpop.f32.mrf.mxu1 }
 0x22b   : > { %v1864_v51 = vpop.f32.mrf.mxu2 }
 0x22c   : > { %v1865_v16 = vadd.f32 %v3344_v40, %v1864_v51  ;;  %v3453_v51 = vld [vmem:[%s3714_s4] ss:$0 sm:$0xff] }
 0x22d   : > { %v1413_v15 = vpop.permute.xlu1 %1412 }
 0x22e   : > { %v1473_v32 = vpop.permute.xlu2 %1472  ;;  %v1934_v39 = vmax.f32 %v1865_v16, 0.0  ;;  %v1349_v46 = vpop.permute.xlu0 %1348 }
 0x22f   : > { %v1606_v47 = vsel %vm1580_vm9, %v1573_v57, %v1349_v46  ;;  %v1057_v57 = vadd.f32 %v3453_v51, %v3138_v11  ;;  %v1547_v11 = vsel %vm994_vm8, %v2658_v28, %v3035_v50 }
 0x230   : > { %v1639_v20 = vsel %vm1613_vm10, %v1606_v47, %v1381_v2  ;;  %2005 = vrot.lane.b32.xlu0 %v1934_v39, %s2424_s20  ;;  %v1063_v46 = vpop.f32.mrf.mxu1 }
 0x231   : > { %v1672_v8 = vsel %vm1646_vm11, %v1639_v20, %v1413_v15  ;;  %v1136_v47 = vmax.f32 %v1057_v57, 0.0 }
 0x232   : > { %v1705_v41 = vsel %vm1679_vm12, %v1672_v8, %v2885_v53 }
 0x233   : > { %v1867_v48 = vpop.f32.mrf.mxu2  ;;  %v1738_v55 = vsel %vm1712_vm13, %v1705_v41, %v2907_v18  ;;  %v1537_v18 = vsel %vm994_vm8, %v2998_v6, %v3360_v30 }
 0x234   : > { %v1868_v24 = vadd.f32 %v3344_v40, %v1867_v48  ;;  %v1771_v17 = vsel %vm1745_vm14, %v1738_v55, %v2876_v49  ;;  %v1064_v55 = vadd.f32 %v3453_v51, %v1063_v46 }
 0x235   : > { %v1287_v12 = vpop.permute.xlu1 %1286  ;;  %2288 = vmatmul.msk.bf16.vlgmr.msra.gmra.mxu3 %vm1802_vm15, %v1771_v17 }
 0x236   : > { %v1543_v36 = vsel %vm994_vm8, %v3144_v60, %v1287_v12  ;;  %v1513_v13 = vpop.permute.xlu2 %1512  ;;  %v1935_v9 = vmax.f32 %v1868_v24, 0.0  ;;  %v1319_v23 = vpop.permute.xlu0 %1318  ;;  %v1569_v60 = vsel %vm331_vm1, %v1537_v18, %v3353_v3 }
 0x237   : > { %v1575_v53 = vsel %vm331_vm1, %v1543_v36, %v1319_v23  ;;  %v1602_v1 = vsel %vm1580_vm9, %v1569_v60, %v1345_v59  ;;  %v1139_v36 = vmax.f32 %v1064_v55, 0.0 }
 0x238   : > { %v1608_v5 = vsel %vm1580_vm9, %v1575_v53, %v2820_v58  ;;  %2007 = vrot.lane.b32.xlu1 %v1935_v9, %s2424_s20  ;;  %v1066_v24 = vpop.f32.mrf.mxu1 }
 0x239   : > { %v1641_v49 = vsel %vm1613_vm10, %v1608_v5, %v2902_v14  ;;  %v1635_v14 = vsel %vm1613_vm10, %v1602_v1, %v1377_v19 }
 0x23a   : > { %v1674_v44 = vsel %vm1646_vm11, %v1641_v49, %v2924_v21  ;;  %v1668_v3 = vsel %vm1646_vm11, %v1635_v14, %v1409_v22 }
 0x23b   : > { %v1869_v10 = vpop.f32.mrf.mxu2  ;;  %v1707_v52 = vsel %vm1679_vm12, %v1674_v44, %v2922_v26 }
 0x23c   : > { %v1870_v38 = vadd.f32 %v3344_v40, %v1869_v10  ;;  %v1740_v59 = vsel %vm1712_vm13, %v1707_v52, %v3013_v42 }
 0x23d   : > { %v1449_v6 = vpop.permute.xlu1 %1448  ;;  %v1773_v2 = vsel %vm1745_vm14, %v1740_v59, %v3017_v7  ;;  %v1676_v7 = vsel %vm1646_vm11, %v3067_v27, %v1417_v54 }
 0x23e   : > { %v3428_v30 = vpop.permute.xlu2 %1346  ;;  %v1936_v58 = vmax.f32 %v1870_v38, 0.0  ;;  %v1441_v56 = vpop.permute.xlu0 %1440  ;;  %v1709_v0 = vsel %vm1679_vm12, %v1676_v7, %v1449_v6 }
 0x23f   : > { %v1701_v21 = vsel %vm1679_vm12, %v1668_v3, %v1441_v56 }
 0x240   : > { %2009 = vrot.lane.b32.xlu2 %v1936_v58, %s2424_s20  ;;  %v1734_v35 = vsel %vm1712_vm13, %v1701_v21, %v1473_v32  ;;  %v1068_v6 = vpop.f32.mrf.mxu1 }
 0x245   : > { %v1505_v37 = vpop.permute.xlu1 %1504  ;;  %2289 = vmatmul.msk.bf16.gmra.mxu3 %vm1802_vm15, %v1773_v2 }
 0x246   : > { %v1387_v26 = vpop.permute.xlu2 %1386  ;;  %v1767_v19 = vsel %vm1745_vm14, %v1734_v35, %v1505_v37  ;;  %v1481_v22 = vpop.permute.xlu0 %1480  ;;  %v1062_v37 = vadd.f32 %v3453_v51, %v1061_v31  ;;  %v1059_v35 = vadd.f32 %v3453_v51, %v3162_v43 }
 0x247   : > { %2286 = vmatmul.msk.bf16.gmra.mxu2 %vm1802_vm15, %v1767_v19  ;;  %v1742_v63 = vsel %vm1712_vm13, %v1709_v0, %v1481_v22  ;;  %v1067_v0 = vadd.f32 %v3453_v51, %v1066_v24 }
 0x248   : > { %v1775_v32 = vsel %vm1745_vm14, %v1742_v63, %v1513_v13  ;;  %v1539_v13 = vsel %vm994_vm8, %v3039_v33, %v3375_v62  ;;  %v1071_v22 = vpop.f32.mrf.mxu1 }
 0x249   : > { %v1072_v63 = vadd.f32 %v3453_v51, %v1071_v22 }
 0x24b   : > { %v1872_v29 = vpop.f32.mrf.mxu2 }
 0x24c   : > { %v1873_v61 = vadd.f32 %v3344_v40, %v1872_v29 }
 0x24d   : > { %v1323_v45 = vpop.permute.xlu1 %1322 }
 0x24e   : > { %v1443_v4 = vpop.permute.xlu2 %1442  ;;  %v1937_v42 = vmax.f32 %v1873_v61, 0.0  ;;  %v1315_v34 = vpop.permute.xlu0 %1314  ;;  %v1579_v12 = vsel %vm331_vm1, %v1547_v11, %v1323_v45  ;;  %v1137_v45 = vmax.f32 %v1059_v35, 0.0 }
 0x24f   : > { %v1571_v18 = vsel %vm331_vm1, %v1539_v13, %v1315_v34 }
 0x250   : > { %2011 = vrot.lane.b32.xlu0 %v1937_v42, %s2424_s20  ;;  %v1604_v10 = vsel %vm1580_vm9, %v1571_v18, %v3428_v30 }
 0x253   : > { %v1874_v25 = vpop.f32.mrf.mxu2 }
 0x254   : > { %v1875_v16 = vadd.f32 %v3344_v40, %v1874_v25  ;;  %v1073_v25 = vpop.f32.mrf.mxu1 }
 0x255   : > { %v1379_v15 = vpop.permute.xlu1 %1378  ;;  %2290 = vmatmul.msk.bf16.gmra.mxu3 %vm1802_vm15, %v1775_v32  ;;  %v1140_v32 = vmax.f32 %v1067_v0, 0.0 }
 0x256   : > { %v1483_v27 = vpop.permute.xlu2 %1482  ;;  %v1938_v54 = vmax.f32 %v1875_v16, 0.0  ;;  %v1355_v39 = vpop.permute.xlu0 %1354  ;;  %v1637_v62 = vsel %vm1613_vm10, %v1604_v10, %v1379_v15 }
 0x257   : > { %v1612_v9 = vsel %vm1580_vm9, %v1579_v12, %v1355_v39  ;;  %v3515_v15 = vpop.f32.mrf.mxu3 }
 0x258   : > { %2013 = vrot.lane.b32.xlu1 %v1938_v54, %s2424_s20  ;;  %v1645_v60 = vsel %vm1613_vm10, %v1612_v9, %v1387_v26  ;;  %v1138_v26 = vmax.f32 %v1062_v37, 0.0 }
 0x25d   : > { %v1419_v20 = vpop.permute.xlu1 %1418 }
 0x25e   : > { %v1992_v8 = vpop.permute.xlu2 %1991  ;;  %v1411_v48 = vpop.permute.xlu0 %1410  ;;  %v1678_v33 = vsel %vm1646_vm11, %v1645_v60, %v1419_v20 }
 0x25f   : > { %v2087_v41 = vsel %vm331_vm1, %v1136_v47, %v1992_v8  ;;  %v1670_v1 = vsel %vm1646_vm11, %v1637_v62, %v1411_v48  ;;  %v1069_v47 = vadd.f32 %v3453_v51, %v1068_v6  ;;  %v1076_v20 = vpop.f32.mrf.mxu1  ;;  %v3525_v55 = vpop.f32.mrf.mxu3 }
 0x260   : > { %2119 = vst.msk [vmem:[%s3465_s17] sm:$0xff] %vm1613_vm10, %v2087_v41  ;;  %v1703_v14 = vsel %vm1679_vm12, %v1670_v1, %v1443_v4  ;;  %v1077_v1 = vadd.f32 %v3453_v51, %v1076_v20 }
 0x261   : > { %v1141_v8 = vmax.f32 %v1069_v47, 0.0 }
 0x263   : > { %v1877_v17 = vpop.f32.mrf.mxu2 }
 0x264   : > { %v1878_v23 = vadd.f32 %v3344_v40, %v1877_v17 }
 0x265   : > { %v1475_v53 = vpop.permute.xlu1 %1474 }
 0x266   : > { %v1998_v5 = vpop.permute.xlu2 %1997  ;;  %v1939_v49 = vmax.f32 %v1878_v23, 0.0  ;;  %v1451_v50 = vpop.permute.xlu0 %1450  ;;  %v1736_v3 = vsel %vm1712_vm13, %v1703_v14, %v1475_v53 }
 0x267   : > { %v2090_v28 = vsel %vm331_vm1, %v1139_v36, %v1998_v5  ;;  %v1711_v44 = vsel %vm1679_vm12, %v1678_v33, %v1451_v50  ;;  %v1078_v11 = vpop.f32.mrf.mxu1  ;;  %v3530_v17 = vpop.f32.mrf.mxu3 }
 0x268   : > { %2122 = vst.msk [vmem:[%s3465_s17 + $0x18] sm:$0xff] %vm1613_vm10, %v2090_v28  ;;  %2015 = vrot.lane.b32.xlu2 %v1939_v49, %s2424_s20  ;;  %v1744_v52 = vsel %vm1712_vm13, %v1711_v44, %v1483_v27  ;;  %v1142_v27 = vmax.f32 %v1072_v63, 0.0  ;;  %v1079_v36 = vadd.f32 %v3453_v51, %v1078_v11  ;;  %v1074_v49 = vadd.f32 %v3453_v51, %v1073_v25 }
 0x26a   : > { %v1145_v9 = vmax.f32 %v1079_v36, 0.0  ;;  %v1143_v60 = vmax.f32 %v1074_v49, 0.0 }
 0x26b   : > { %v1879_v38 = vpop.f32.mrf.mxu2 }
 0x26c   : > { %v1880_v58 = vadd.f32 %v3344_v40, %v1879_v38 }
 0x26d   : > { %v1515_v56 = vpop.permute.xlu1 %1514 }
 0x26e   : > { %v1777_v30 = vsel %vm1745_vm14, %v1744_v52, %v1515_v56  ;;  %v1940_v21 = vmax.f32 %v1880_v58, 0.0  ;;  %v1507_v59 = vpop.permute.xlu0 %1506  ;;  %v1144_v56 = vmax.f32 %v1077_v1, 0.0 }
 0x26f   : > { %2291 = vmatmul.msk.bf16.gmra.mxu3 %vm1802_vm15, %v1777_v30  ;;  %v1769_v2 = vsel %vm1745_vm14, %v1736_v3, %v1507_v59  ;;  %v3539_v50 = vpop.f32.mrf.mxu3  ;;  %v1081_v10 = vpop.f32.mrf.mxu1 }
 0x270   : > { %2017 = vrot.lane.b32.xlu0 %v1940_v21, %s2424_s20  ;;  %2287 = vmatmul.msk.bf16.gmra.mxu2 %vm1802_vm15, %v1769_v2 }
 0x274   : > { %v1882_v19 = vpop.f32.mrf.mxu2 }
 0x275   : > { %v1996_v29 = vpop.permute.xlu1 %1995  ;;  %v1883_v61 = vadd.f32 %v3344_v40, %v1882_v19 }
 0x276   : > { %v2089_v4 = vsel %vm331_vm1, %v1138_v26, %v1996_v29  ;;  %v1994_v34 = vpop.permute.xlu0 %1993  ;;  %v1082_v26 = vadd.f32 %v3453_v51, %v1081_v10 }
 0x277   : > { %2121 = vst.msk [vmem:[%s3465_s17 + $0x10] sm:$0xff] %vm1613_vm10, %v2089_v4  ;;  %v1941_v42 = vmax.f32 %v1883_v61, 0.0  ;;  %v2088_v7 = vsel %vm331_vm1, %v1137_v45, %v1994_v34  ;;  %v3547_v6 = vpop.f32.mrf.mxu3  ;;  %v1083_v30 = vpop.f32.mrf.mxu1 }
 0x278   : > { %2120 = vst.msk [vmem:[%s3465_s17 + $0x8] sm:$0xff] %vm1613_vm10, %v2088_v7  ;;  %v1146_v29 = vmax.f32 %v1082_v26, 0.0 }
 0x279   : > { %2019 = vrot.lane.b32.xlu1 %v1941_v42, %s2424_s20 }
 0x27c   : > { %v1884_v43 = vpop.f32.mrf.mxu2 }
 0x27d   : > { %v1885_v31 = vadd.f32 %v3344_v40, %v1884_v43  ;;  %v1084_v43 = vadd.f32 %v3453_v51, %v1083_v30 }
 0x27f   : > { %v1942_v16 = vmax.f32 %v1885_v31, 0.0  ;;  %v3554_v37 = vpop.f32.mrf.mxu3  ;;  %v1086_v2 = vpop.f32.mrf.mxu1  ;;  %v1147_v0 = vmax.f32 %v1084_v43, 0.0 }
 0x280   : > { %v1087_v19 = vadd.f32 %v3453_v51, %v1086_v2 }
 0x281   : > { %2021 = vrot.lane.b32.xlu2 %v1942_v16, %s2424_s20 }
 0x282   : > { %v2004_v54 = vpop.permute.xlu2 %2003  ;;  %v1148_v61 = vmax.f32 %v1087_v19, 0.0 }
 0x283   : > { %v2000_v39 = vpop.permute.xlu0 %1999  ;;  %v2093_v57 = vsel %vm331_vm1, %v1142_v27, %v2004_v54 }
 0x284   : > { %v2091_v46 = vsel %vm331_vm1, %v1140_v32, %v2000_v39  ;;  %2125 = vst.msk [vmem:[%s3465_s17 + $0x30] sm:$0xff] %vm1613_vm10, %v2093_v57 }
 0x285   : > { %2123 = vst.msk [vmem:[%s3465_s17 + $0x20] sm:$0xff] %vm1613_vm10, %v2091_v46 }
 0x287   : > { %v1088_v22 = vpop.f32.mrf.mxu1 }
 0x288   : > { %v1089_v36 = vadd.f32 %v3453_v51, %v1088_v22 }
 0x28b   : > { %v2002_v41 = vpop.permute.xlu1 %2001 }
 0x28c   : > { %v2092_v48 = vsel %vm331_vm1, %v1141_v8, %v2002_v41 }
 0x28d   : > { %2124 = vst.msk [vmem:[%s3465_s17 + $0x28] sm:$0xff] %vm1613_vm10, %v2092_v48 }
 0x28f   : > { %v1091_v31 = vpop.f32.mrf.mxu1 }
 0x293   : > { %v1887_v24 = vpop.f32.mrf.mxu2 }
 0x294   : > { %v1888_v12 = vadd.f32 %v3344_v40, %v1887_v24 }
 0x296   : > { %v1943_v13 = vmax.f32 %v1888_v12, 0.0 }
 0x297   : > { %v1093_v57 = vpop.f32.mrf.mxu1 }
 0x298   : > { %2023 = vrot.lane.b32.xlu0 %v1943_v13, %s2424_s20  ;;  %v1094_v20 = vadd.f32 %v3453_v51, %v1093_v57 }
 0x29a   : > { %v2010_v23 = vpop.permute.xlu2 %2009  ;;  %v1151_v48 = vmax.f32 %v1094_v20, 0.0 }
 0x29b   : > { %v1889_v53 = vpop.f32.mrf.mxu2  ;;  %v2096_v18 = vsel %vm331_vm1, %v1145_v9, %v2010_v23  ;;  %v1149_v23 = vmax.f32 %v1089_v36, 0.0 }
 0x29c   : > { %v1890_v5 = vadd.f32 %v3344_v40, %v1889_v53  ;;  %2128 = vst.msk [vmem:[%s3465_s17 + $0x48] sm:$0xff] %vm1613_vm10, %v2096_v18 }
 0x29e   : > { %v1944_v28 = vmax.f32 %v1890_v5, 0.0 }
 0x29f   : > { %v1096_v5 = vpop.f32.mrf.mxu1 }
 0x2a0   : > { %2025 = vrot.lane.b32.xlu1 %v1944_v28, %s2424_s20  ;;  %v1092_v28 = vadd.f32 %v3453_v51, %v1091_v31 }
 0x2a2   : > { %v2006_v33 = vpop.permute.xlu0 %2005 }
 0x2a3   : > { %v2094_v62 = vsel %vm331_vm1, %v1143_v60, %v2006_v33  ;;  %v1150_v60 = vmax.f32 %v1092_v28, 0.0  ;;  %v1124_v28 = vadd.f32 %v3453_v51, %v3525_v55 }
 0x2a4   : > { %2126 = vst.msk [vmem:[%s3465_s17 + $0x38] sm:$0xff] %vm1613_vm10, %v2094_v62  ;;  %v1892_v44 = vpop.f32.mrf.mxu2 }
 0x2a5   : > { %v1893_v38 = vadd.f32 %v3344_v40, %v1892_v44 }
 0x2a7   : > { %v1945_v58 = vmax.f32 %v1893_v38, 0.0  ;;  %v1098_v44 = vpop.f32.mrf.mxu1 }
 0x2a9   : > { %2027 = vrot.lane.b32.xlu2 %v1945_v58, %s2424_s20 }
 0x2aa   : > { %v2008_v52 = vpop.permute.xlu1 %2007 }
 0x2ab   : > { %v2095_v14 = vsel %vm331_vm1, %v1144_v56, %v2008_v52 }
 0x2ac   : > { %2127 = vst.msk [vmem:[%s3465_s17 + $0x40] sm:$0xff] %vm1613_vm10, %v2095_v14  ;;  %v1894_v3 = vpop.f32.mrf.mxu2 }
 0x2ad   : > { %v1895_v21 = vadd.f32 %v3344_v40, %v1894_v3 }
 0x2af   : > { %v1946_v59 = vmax.f32 %v1895_v21, 0.0  ;;  %v1101_v14 = vpop.f32.mrf.mxu1 }
 0x2b0   : > { %v1102_v2 = vadd.f32 %v3453_v51, %v1101_v14 }
 0x2b1   : > { %2029 = vrot.lane.b32.xlu0 %v1946_v59, %s2424_s20 }
 0x2b2   : > { %v1154_v22 = vmax.f32 %v1102_v2, 0.0 }
 0x2b7   : > { %v1103_v19 = vpop.f32.mrf.mxu1 }
 0x2b8   : > { %v1907_v35 = vpop.f32.mrf.mxu3  ;;  %v1104_v20 = vadd.f32 %v3453_v51, %v1103_v19 }
 0x2b9   : > { %v1908_v41 = vadd.f32 %v3344_v40, %v1907_v35 }
 0x2bb   : > { %v1951_v12 = vmax.f32 %v1908_v41, 0.0  ;;  %v1155_v41 = vmax.f32 %v1104_v20, 0.0 }
 0x2c0   : > { %v1909_v45 = vpop.f32.mrf.mxu3 }
 0x2c1   : > { %v1910_v3 = vadd.f32 %v3344_v40, %v1909_v45  ;;  %v1097_v45 = vadd.f32 %v3453_v51, %v1096_v5 }
 0x2c2   : > { %v2016_v4 = vpop.permute.xlu2 %2015  ;;  %v2012_v42 = vpop.permute.xlu0 %2011 }
 0x2c3   : > { %v2099_v34 = vsel %vm331_vm1, %v1148_v61, %v2016_v4  ;;  %v2097_v7 = vsel %vm331_vm1, %v1146_v29, %v2012_v42  ;;  %v1952_v35 = vmax.f32 %v1910_v3, 0.0  ;;  %v1152_v31 = vmax.f32 %v1097_v45, 0.0 }
 0x2c4   : > { %2131 = vst.msk [vmem:[%s3465_s17 + $0x60] sm:$0xff] %vm1613_vm10, %v2099_v34  ;;  %v1127_v45 = vadd.f32 %v3453_v51, %v3530_v17  ;;  %v1134_v17 = vadd.f32 %v3453_v51, %v3554_v37 }
 0x2c5   : > { %2129 = vst.msk [vmem:[%s3465_s17 + $0x50] sm:$0xff] %vm1613_vm10, %v2097_v7 }
 0x2c8   : > { %v1912_v32 = vpop.f32.mrf.mxu3 }
 0x2c9   : > { %v1913_v29 = vadd.f32 %v3344_v40, %v1912_v32 }
 0x2ca   : > { %v1897_v63 = vpop.f32.mrf.mxu2  ;;  %v2014_v16 = vpop.permute.xlu1 %2013 }
 0x2cb   : > { %v1898_v25 = vadd.f32 %v3344_v40, %v1897_v63  ;;  %v2098_v27 = vsel %vm331_vm1, %v1147_v0, %v2014_v16  ;;  %v1953_v34 = vmax.f32 %v1913_v29, 0.0  ;;  %v1106_v63 = vpop.f32.mrf.mxu1 }
 0x2cc   : > { %2130 = vst.msk [vmem:[%s3465_s17 + $0x58] sm:$0xff] %vm1613_vm10, %v2098_v27  ;;  %v1099_v27 = vadd.f32 %v3453_v51, %v1098_v44 }
 0x2cd   : > { %v1947_v54 = vmax.f32 %v1898_v25, 0.0 }
 0x2ce   : > { %v1153_v57 = vmax.f32 %v1099_v27, 0.0 }
 0x2cf   : > { %2031 = vrot.lane.b32.xlu1 %v1947_v54, %s2424_s20 }
 0x2d0   : > { %v1914_v8 = vpop.f32.mrf.mxu3 }
 0x2d1   : > { %v1915_v9 = vadd.f32 %v3344_v40, %v1914_v8 }
 0x2d2   : > { %v1899_v39 = vpop.f32.mrf.mxu2 }
 0x2d3   : > { %v1900_v46 = vadd.f32 %v3344_v40, %v1899_v39  ;;  %v1954_v49 = vmax.f32 %v1915_v9, 0.0 }
 0x2d5   : > { %v1948_v47 = vmax.f32 %v1900_v46, 0.0 }
 0x2d7   : > { %2033 = vrot.lane.b32.xlu2 %v1948_v47, %s2424_s20 }
 0x2d8   : > { %v1917_v13 = vpop.f32.mrf.mxu3 }
 0x2d9   : > { %v1918_v61 = vadd.f32 %v3344_v40, %v1917_v13 }
 0x2db   : > { %v2022_v11 = vpop.permute.xlu2 %2021  ;;  %v1955_v7 = vmax.f32 %v1918_v61, 0.0 }
 0x2dc   : > { %v2102_v24 = vsel %vm331_vm1, %v1151_v48, %v2022_v11 }
 0x2dd   : > { %2134 = vst.msk [vmem:[%s3465_s17 + $0x78] sm:$0xff] %vm1613_vm10, %v2102_v24 }
 0x2df   : > { %2039 = vrot.lane.b32.xlu2 %v1951_v12, %s2424_s20 }
 0x2e0   : > { %v1919_v10 = vpop.f32.mrf.mxu3 }
 0x2e1   : > { %v1920_v25 = vadd.f32 %v3344_v40, %v1919_v10  ;;  %v1163_v10 = vmax.f32 %v1124_v28, 0.0 }
 0x2e2   : > { %v2018_v53 = vpop.permute.xlu0 %2017 }
 0x2e3   : > { %v2100_v18 = vsel %vm331_vm1, %v1149_v23, %v2018_v53  ;;  %v1956_v54 = vmax.f32 %v1920_v25, 0.0  ;;  %v1167_v25 = vmax.f32 %v1134_v17, 0.0 }
 0x2e4   : > { %2132 = vst.msk [vmem:[%s3465_s17 + $0x68] sm:$0xff] %vm1613_vm10, %v2100_v18 }
 0x2e7   : > { %2045 = vrot.lane.b32.xlu2 %v1954_v49, %s2424_s20 }
 0x2eb   : > { %v2020_v33 = vpop.permute.xlu1 %2019 }
 0x2ec   : > { %v2101_v62 = vsel %vm331_vm1, %v1150_v60, %v2020_v33  ;;  %v1107_v60 = vadd.f32 %v3453_v51, %v1106_v63 }
 0x2ed   : > { %2133 = vst.msk [vmem:[%s3465_s17 + $0x70] sm:$0xff] %vm1613_vm10, %v2101_v62 }
 0x2ee   : > { %v1156_v33 = vmax.f32 %v1107_v60, 0.0 }
 0x2f2   : > { %v1922_v1 = vpop.f32.mrf.mxu3 }
 0x2f3   : > { %v1923_v38 = vadd.f32 %v3344_v40, %v1922_v1  ;;  %v1902_v58 = vpop.f32.mrf.mxu2 }
 0x2f4   : > { %v1903_v52 = vadd.f32 %v3344_v40, %v1902_v58  ;;  %v1132_v58 = vadd.f32 %v3453_v51, %v3547_v6 }
 0x2f5   : > { %v1957_v56 = vmax.f32 %v1923_v38, 0.0 }
 0x2f6   : > { %v1949_v30 = vmax.f32 %v1903_v52, 0.0 }
 0x2f7   : > { %2051 = vrot.lane.b32.xlu2 %v1957_v56, %s2424_s20  ;;  %v1166_v56 = vmax.f32 %v1132_v58, 0.0 }
 0x2f8   : > { %2035 = vrot.lane.b32.xlu0 %v1949_v30, %s2424_s20 }
 0x2fa   : > { %v1924_v43 = vpop.f32.mrf.mxu3 }
 0x2fb   : > { %v1904_v21 = vpop.f32.mrf.mxu2  ;;  %v1925_v16 = vadd.f32 %v3344_v40, %v1924_v43 }
 0x2fc   : > { %v1905_v59 = vadd.f32 %v3344_v40, %v1904_v21  ;;  %v1108_v40 = vpop.f32.mrf.mxu1 }
 0x2fd   : > { %v1958_v39 = vmax.f32 %v1925_v16, 0.0  ;;  %v1109_v12 = vadd.f32 %v3453_v51, %v1108_v40 }
 0x2fe   : > { %v1950_v26 = vmax.f32 %v1905_v59, 0.0 }
 0x2ff   : > { %v1157_v36 = vmax.f32 %v1109_v12, 0.0 }
 0x300   : > { %2037 = vrot.lane.b32.xlu1 %v1950_v26, %s2424_s20  ;;  %2041 = vrot.lane.b32.xlu0 %v1952_v35, %s2424_s20 }
 0x303   : > { %v2028_v4 = vpop.permute.xlu2 %2027 }
 0x304   : > { %v2105_v42 = vsel %vm331_vm1, %v1154_v22, %v2028_v4  ;;  %v1111_v8 = vpop.f32.mrf.mxu1  ;;  %v1122_v4 = vadd.f32 %v3453_v51, %v3515_v15  ;;  %v1129_v15 = vadd.f32 %v3453_v51, %v3539_v50 }
 0x305   : > { %2137 = vst.msk [vmem:[%s3465_s17 + $0x90] sm:$0xff] %vm1613_vm10, %v2105_v42  ;;  %v1112_v14 = vadd.f32 %v3453_v51, %v1111_v8 }
 0x306   : > { %v1162_v42 = vmax.f32 %v1122_v4, 0.0  ;;  %v1165_v63 = vmax.f32 %v1129_v15, 0.0 }
 0x307   : > { %v1158_v30 = vmax.f32 %v1112_v14, 0.0 }
 0x308   : > { %2043 = vrot.lane.b32.xlu1 %v1953_v34, %s2424_s20  ;;  %2047 = vrot.lane.b32.xlu0 %v1955_v7, %s2424_s20  ;;  %v1164_v34 = vmax.f32 %v1127_v45, 0.0 }
 0x30a   : > { %v2024_v0 = vpop.permute.xlu0 %2023 }
 0x30b   : > { %v2103_v32 = vsel %vm331_vm1, %v1152_v31, %v2024_v0 }
 0x30c   : > { %2135 = vst.msk [vmem:[%s3465_s17 + $0x80] sm:$0xff] %vm1613_vm10, %v2103_v32  ;;  %v1113_v24 = vpop.f32.mrf.mxu1 }
 0x30d   : > { %v1114_v2 = vadd.f32 %v3453_v51, %v1113_v24 }
 0x30f   : > { %v1159_v35 = vmax.f32 %v1114_v2, 0.0 }
 0x310   : > { %2049 = vrot.lane.b32.xlu1 %v1956_v54, %s2424_s20  ;;  %2053 = vrot.lane.b32.xlu0 %v1958_v39, %s2424_s20 }
 0x312   : > { %v2026_v46 = vpop.permute.xlu1 %2025 }
 0x313   : > { %v2104_v47 = vsel %vm331_vm1, %v1153_v57, %v2026_v46 }
 0x314   : > { %2136 = vst.msk [vmem:[%s3465_s17 + $0x88] sm:$0xff] %vm1613_vm10, %v2104_v47  ;;  %v1116_v23 = vpop.f32.mrf.mxu1 }
 0x315   : > { %v1117_v53 = vadd.f32 %v3453_v51, %v1116_v23 }
 0x317   : > { %v1160_v18 = vmax.f32 %v1117_v53, 0.0 }
 0x31c   : > { %v1118_v3 = vpop.f32.mrf.mxu1 }
 0x31d   : > { %v1119_v6 = vadd.f32 %v3453_v51, %v1118_v3 }
 0x31f   : > { %v1161_v26 = vmax.f32 %v1119_v6, 0.0 }
 0x323   : > { %v2030_v48 = vpop.permute.xlu0 %2029 }
 0x324   : > { %v2106_v11 = vsel %vm331_vm1, %v1155_v41, %v2030_v48 }
 0x325   : > { %2138 = vst.msk [vmem:[%s3465_s17 + $0x98] sm:$0xff] %vm1613_vm10, %v2106_v11 }
 0x331   : > { %v2034_v13 = vpop.permute.xlu2 %2033 }
 0x332   : > { %v2108_v9 = vsel %vm331_vm1, %v1157_v36, %v2034_v13 }
 0x333   : > { %2140 = vst.msk [vmem:[%s3465_s17 + $0xa8] sm:$0xff] %vm1613_vm10, %v2108_v9 }
 0x339   : > { %v2040_v5 = vpop.permute.xlu2 %2039 }
 0x33a   : > { %v2111_v49 = vsel %vm331_vm1, %v1160_v18, %v2040_v5 }
 0x33b   : > { %2143 = vst.msk [vmem:[%s3465_s17 + $0xc0] sm:$0xff] %vm1613_vm10, %v2111_v49 }
 0x341   : > { %v2046_v62 = vpop.permute.xlu2 %2045  ;;  %v2032_v44 = vpop.permute.xlu1 %2031 }
 0x342   : > { %v2114_v1 = vsel %vm331_vm1, %v1163_v10, %v2046_v62  ;;  %v2107_v38 = vsel %vm331_vm1, %v1156_v33, %v2032_v44 }
 0x343   : > { %2146 = vst.msk [vmem:[%s3465_s17 + $0xd8] sm:$0xff] %vm1613_vm10, %v2114_v1 }
 0x344   : > { %2139 = vst.msk [vmem:[%s3465_s17 + $0xa0] sm:$0xff] %vm1613_vm10, %v2107_v38 }
 0x351   : > { %v2052_v55 = vpop.permute.xlu2 %2051 }
 0x352   : > { %v2117_v52 = vsel %vm331_vm1, %v1166_v56, %v2052_v55 }
 0x353   : > { %2149 = vst.msk [vmem:[%s3465_s17 + $0xf0] sm:$0xff] %vm1613_vm10, %v2117_v52 }
 0x36a   : > { %v2036_v21 = vpop.permute.xlu0 %2035 }
 0x36b   : > { %v2109_v59 = vsel %vm331_vm1, %v1158_v30, %v2036_v21 }
 0x36c   : > { %2141 = vst.msk [vmem:[%s3465_s17 + $0xb0] sm:$0xff] %vm1613_vm10, %v2109_v59 }
 0x372   : > { %v2038_v19 = vpop.permute.xlu1 %2037  ;;  %v2042_v22 = vpop.permute.xlu0 %2041 }
 0x373   : > { %v2110_v29 = vsel %vm331_vm1, %v1159_v35, %v2038_v19  ;;  %v2112_v61 = vsel %vm331_vm1, %v1161_v26, %v2042_v22 }
 0x374   : > { %2142 = vst.msk [vmem:[%s3465_s17 + $0xb8] sm:$0xff] %vm1613_vm10, %v2110_v29 }
 0x375   : > { %2144 = vst.msk [vmem:[%s3465_s17 + $0xc8] sm:$0xff] %vm1613_vm10, %v2112_v61 }
 0x37a   : > { %v2044_v7 = vpop.permute.xlu1 %2043  ;;  %v2048_v43 = vpop.permute.xlu0 %2047 }
 0x37b   : > { %v2113_v31 = vsel %vm331_vm1, %v1162_v42, %v2044_v7  ;;  %v2115_v0 = vsel %vm331_vm1, %v1164_v34, %v2048_v43 }
 0x37c   : > { %2145 = vst.msk [vmem:[%s3465_s17 + $0xd0] sm:$0xff] %vm1613_vm10, %v2113_v31 }
 0x37d   : > { %2147 = vst.msk [vmem:[%s3465_s17 + $0xe0] sm:$0xff] %vm1613_vm10, %v2115_v0 }
 0x382   : > { %v2050_v16 = vpop.permute.xlu1 %2049  ;;  %v2054_v32 = vpop.permute.xlu0 %2053 }
 0x383   : > { %v2116_v50 = vsel %vm331_vm1, %v1165_v63, %v2050_v16  ;;  %v2118_v27 = vsel %vm331_vm1, %v1167_v25, %v2054_v32 }
 0x384   : > { %2148 = vst.msk [vmem:[%s3465_s17 + $0xe8] sm:$0xff] %vm1613_vm10, %v2116_v50 }
 0x385   : > { %2150 = vst.msk [vmem:[%s3465_s17 + $0xf8] sm:$0xff] %vm1613_vm10, %v2118_v27 }
 0x386   : > { %2386 = shalt.err (!%p2383_p3)
}
 0x387   : > { %s2432_s15 = smov 128  }
 0x388   : > { %2306 = dma.vmem_to_hbm [thread:$0]  (%p2511_p5), %s2165_s8, 4096, %s2167_s18, %s2152_s19, %s2432_s15, %s2432_s15, %s2424_s20  }
 0x389 PF: > { %p2312_p4 = scmp.ge.s32.totalorder %s2421_s27, 2  ;;  %s2181_s17 = sand.u32 1, %s2409_s24  }
 0x38a   : > { %s2182_s29 = scalar_lea.sflag [#allocation3], %s2181_s17 }
 0x38b   : > { %p2309_p7 = pnand %p2312_p4, %p2515_p6 }
 0x38d   : > { %p2310_p8 = pneg %p2309_p7 }
 0x38f   : > { %2404 = dma.done.wait (%p2310_p8), %s2182_s29, 4096  }
 0x390   : > { %2406 = vsyncadd (%p2310_p8), %s2182_s29, 4294963200  ;;  %p17_p9 = scmp.ge.s32.totalorder %s2498_s30, 4   ;;  %s3722_s24 = smov %s2413_s25 }
 0x391   : > { %s3723_s25 = smov %s2417_s26  ;;  %s3724_s26 = smov %s2509_s10 }
 0x392   : > { %s3725_s27 = smov %s2498_s30  ;;  %19 = sbr.rel (!%p17_p9) target bundleno = 3 (0x3), region = 83 }
 0x397   :  { %2188 = vsyncpa [#allocation3], 1 }
 0x398   :  { %2190 = vsyncpa [#allocation3 + $0x1], 1 }

</bundles_post_ra>
